<compile_context>
chip_gen: v7x
topology: tpu7x:2x2x1
jax: 0.10.0
libtpu: 0.0.40
codegen_flags: <defaults>
</compile_context>

<pallas_src>
import functools

import jax
import jax.numpy as jnp
from jax.experimental import pallas as pl
from jax.experimental.pallas import tpu as pltpu

LANE = 128


def _round_up(x, m):
    return ((x + m - 1) // m) * m


def chebnet_kernel(l_ref, x_ref, p_ref, w1_ref, b1_ref, w2_ref, b2_ref, out_ref,
                   *, K, valid_out):
    """One grid step = one block-diagonal node tile (a batch of whole graphs).

    Shapes seen by the kernel (leading tile dim squeezed by BlockSpec):
      l_ref : [BN, BN]    bf16  block-diagonal scaled Laplacian for this tile
      x_ref : [BN, FP]    bf16  node features (feature dim zero-padded to 128)
      p_ref : [GB, BN]    f32   mean-pool rows for the GB graphs in this tile
      w1_ref: [K*FP, HP]  bf16  fused Chebyshev weights, layer 1 (resident)
      b1_ref: [1, HP]     f32
      w2_ref: [K*HP, OP]  bf16  fused Chebyshev weights, layer 2 (resident)
      b2_ref: [1, OP]     f32
      out   : [GB, OP]    f32   log-probabilities (padded class lanes are junk)
    """
    L = l_ref[...]  # bf16 [BN, BN]

    def cheb_concat(x_bf16):
        # Chebyshev basis T0..T_{K-1}; each term is cast to bf16 as produced
        # (bf16 lane concat), the recurrence carry stays f32; MXU accumulates
        # in f32 via preferred_element_type.
        ts = [x_bf16]
        if K > 1:
            t_prev = x_bf16.astype(jnp.float32)
            t_cur = jnp.dot(L, x_bf16, preferred_element_type=jnp.float32)
            ts.append(t_cur.astype(jnp.bfloat16))
            for _ in range(2, K):
                t_new = 2.0 * jnp.dot(L, t_cur.astype(jnp.bfloat16),
                                      preferred_element_type=jnp.float32) - t_prev
                ts.append(t_new.astype(jnp.bfloat16))
                t_prev, t_cur = t_cur, t_new
        return jnp.concatenate(ts, axis=-1)  # bf16 [BN, K*C]

    # ---- ChebConv 1: single fused K-order projection, then ReLU (f32) ----
    t1 = cheb_concat(x_ref[...])                                        # [BN, K*FP]
    h = jnp.dot(t1, w1_ref[...], preferred_element_type=jnp.float32) + b1_ref[...]
    h = jnp.maximum(h, 0.0)                                             # f32 [BN, HP]

    # ---- ChebConv 2: pool BEFORE the projection (they commute; pool rows sum
    # to 1, so the bias passes through unchanged) ----
    t2 = cheb_concat(h.astype(jnp.bfloat16))                            # [BN, K*HP]
    pooled_t2 = jnp.dot(p_ref[...].astype(jnp.bfloat16), t2,
                        preferred_element_type=jnp.float32)             # [GB, K*HP]
    y = jnp.dot(pooled_t2.astype(jnp.bfloat16), w2_ref[...],
                preferred_element_type=jnp.float32) + b2_ref[...]       # [GB, OP]

    # ---- log_softmax over the valid class lanes only (padded lanes masked) ----
    lane = jax.lax.broadcasted_iota(jnp.int32, y.shape, 1)
    z = jnp.where(lane < valid_out, y, -1e30)
    m = jnp.max(z, axis=1, keepdims=True)
    zz = z - m
    lse = jnp.log(jnp.sum(jnp.exp(zz), axis=1, keepdims=True))
    out_ref[...] = zz - lse


def chebnet_forward(L_tiles, x_tiles, pool_tiles, w1_2d, b1, w2_2d, b2,
                    *, K, valid_out):
    T, BN, _ = L_tiles.shape
    FP = x_tiles.shape[-1]
    GB = pool_tiles.shape[1]
    HP = w1_2d.shape[-1]
    OP = w2_2d.shape[-1]

    flops_per_tile = (
        (K - 1) * 2 * BN * BN * FP + 2 * BN * (K * FP) * HP      # conv1
        + (K - 1) * 2 * BN * BN * HP                             # conv2 recurrence
        + 2 * GB * BN * (K * HP) + 2 * GB * (K * HP) * OP        # pool + conv2 proj
    )
    args = (L_tiles, x_tiles, pool_tiles, w1_2d, b1, w2_2d, b2)
    bytes_accessed = sum(int(a.size) * a.dtype.itemsize for a in args) + T * GB * OP * 4

    grid_spec = pltpu.PrefetchScalarGridSpec(
        num_scalar_prefetch=0,
        grid=(T,),
        in_specs=[
            pl.BlockSpec((None, BN, BN), lambda t: (t, 0, 0)),   # per-tile L block
            pl.BlockSpec((None, BN, FP), lambda t: (t, 0, 0)),   # per-tile x block
            pl.BlockSpec((None, GB, BN), lambda t: (t, 0, 0)),   # per-tile pool rows
            pl.BlockSpec((K * FP, HP), lambda t: (0, 0)),        # w1 (resident)
            pl.BlockSpec((1, HP), lambda t: (0, 0)),             # b1
            pl.BlockSpec((K * HP, OP), lambda t: (0, 0)),        # w2 (resident)
            pl.BlockSpec((1, OP), lambda t: (0, 0)),             # b2
        ],
        out_specs=pl.BlockSpec((None, GB, OP), lambda t: (t, 0, 0)),
    )

    out = pl.pallas_call(
        functools.partial(chebnet_kernel, K=K, valid_out=valid_out),
        out_shape=jax.ShapeDtypeStruct((T, GB, OP), jnp.float32),
        grid_spec=grid_spec,
        compiler_params=pltpu.CompilerParams(
            dimension_semantics=("parallel",),      # node tiles are independent
            vmem_limit_bytes=32 * 1024 * 1024,      # v7x-safe, far above working set
        ),
        cost_estimate=pl.CostEstimate(
            flops=T * flops_per_tile,
            transcendentals=T * GB * (OP + 1),
            bytes_accessed=bytes_accessed,
        ),
    )(*args)
    return out.reshape(T * GB, OP)[:, :valid_out]


# ----------------------------- JAX glue (graph prep) -----------------------------

def build_scaled_laplacian(edge_index, num_nodes, lambda_max=2.0):
    """L_hat = (2/lambda_max) * (I - D^{-1/2} A D^{-1/2}) - I (PyG ChebConv default)."""
    src, dst = edge_index
    A = jnp.zeros((num_nodes, num_nodes), jnp.float32).at[src, dst].add(1.0)
    deg = A.sum(axis=1)
    d_inv_sqrt = jnp.where(deg > 0, 1.0 / jnp.sqrt(deg), 0.0)
    A_norm = d_inv_sqrt[:, None] * A * d_inv_sqrt[None, :]
    eye = jnp.eye(num_nodes, dtype=jnp.float32)
    return (2.0 / lambda_max) * (eye - A_norm) - eye


def build_mean_pool(batch, num_graphs):
    one_hot = (batch[None, :] == jnp.arange(num_graphs)[:, None]).astype(jnp.float32)
    counts = one_hot.sum(axis=1, keepdims=True)
    return one_hot / jnp.maximum(counts, 1.0)


def pad_axis(a, axis, target):
    amount = target - a.shape[axis]
    if amount <= 0:
        return a
    widths = [(0, 0)] * a.ndim
    widths[axis] = (0, amount)
    return jnp.pad(a, widths)


def reference_forward(L_hat, x, w1, b1, w2, b2, P, K):
    """Pure-JAX reference mirroring the kernel's bf16 MXU operands / f32 accumulation,
    but with the original op order (conv2 per-node, then mean pool)."""
    Lb = L_hat.astype(jnp.bfloat16)

    def cheb(x_in, w, b):
        xb = x_in.astype(jnp.bfloat16)
        ts = [xb]
        if K > 1:
            t_prev = xb.astype(jnp.float32)
            t_cur = jnp.dot(Lb, xb, preferred_element_type=jnp.float32)
            ts.append(t_cur.astype(jnp.bfloat16))
            for _ in range(2, K):
                t_new = 2.0 * jnp.dot(Lb, t_cur.astype(jnp.bfloat16),
                                      preferred_element_type=jnp.float32) - t_prev
                ts.append(t_new.astype(jnp.bfloat16))
                t_prev, t_cur = t_cur, t_new
        Tm = jnp.concatenate(ts, axis=-1)
        W = w.astype(jnp.bfloat16).reshape(-1, w.shape[-1])
        return jnp.dot(Tm, W, preferred_element_type=jnp.float32) + b

    h = jnp.maximum(cheb(x, w1, b1), 0.0)
    y = cheb(h, w2, b2)
    pooled = P @ y
    return jax.nn.log_softmax(pooled, axis=1)


if __name__ == "__main__":
    # 32 ring graphs of 8 nodes -> 256 nodes -> 2 block-diagonal node tiles of
    # 128 nodes (16 graphs per tile). BN=128 saturates a v5e MXU pass; >=2 grid
    # steps keep both v7x TensorCores busy. (Bump BN to 256 on v6e/v7x.)
    NODES_PER_GRAPH = 8
    NUM_GRAPHS = 32
    BN = 128                                   # node-tile size
    GB = BN // NODES_PER_GRAPH                 # graphs per tile = 16 (multiple of 8)
    NUM_TILES = NUM_GRAPHS // GB               # 2
    N = NODES_PER_GRAPH * NUM_GRAPHS
    INPUT_DIM, HIDDEN_DIM, OUTPUT_DIM, K = 8, 32, 4, 3
    FP, HP, OP = (_round_up(d, LANE) for d in (INPUT_DIM, HIDDEN_DIM, OUTPUT_DIM))

    edges = []
    for g in range(NUM_GRAPHS):
        base = g * NODES_PER_GRAPH
        for i in range(NODES_PER_GRAPH):
            u, v = base + i, base + (i + 1) % NODES_PER_GRAPH
            edges.append((u, v))
            edges.append((v, u))
    edge_index = jnp.asarray(edges, dtype=jnp.int32).T       # [2, E]
    batch = jnp.repeat(jnp.arange(NUM_GRAPHS, dtype=jnp.int32), NODES_PER_GRAPH)

    key = jax.random.PRNGKey(0)
    kx, k1, k2, kb1, kb2 = jax.random.split(key, 5)
    x = jax.random.normal(kx, (N, INPUT_DIM), jnp.float32)
    w1 = jax.random.normal(k1, (K, INPUT_DIM, HIDDEN_DIM), jnp.float32) * jnp.sqrt(
        2.0 / (INPUT_DIM + HIDDEN_DIM))
    b1 = 0.01 * jax.random.normal(kb1, (1, HIDDEN_DIM), jnp.float32)
    w2 = jax.random.normal(k2, (K, HIDDEN_DIM, OUTPUT_DIM), jnp.float32) * jnp.sqrt(
        2.0 / (HIDDEN_DIM + OUTPUT_DIM))
    b2 = 0.01 * jax.random.normal(kb2, (1, OUTPUT_DIM), jnp.float32)

    L_hat = build_scaled_laplacian(edge_index, N)
    P = build_mean_pool(batch, NUM_GRAPHS)

    # --- Kernel operand prep ---
    # Graphs are disconnected and graph boundaries align with tile boundaries
    # (BN % NODES_PER_GRAPH == 0), so the diagonal BNxBN blocks of L_hat hold the
    # full (block-diagonal) Laplacian of each tile's 16 graphs. Ragged graphs
    # would be zero-padded per graph before this step.
    L_tiles = jnp.stack(
        [L_hat[t * BN:(t + 1) * BN, t * BN:(t + 1) * BN] for t in range(NUM_TILES)]
    ).astype(jnp.bfloat16)                                                 # [T, BN, BN]
    x_tiles = pad_axis(x.reshape(NUM_TILES, BN, INPUT_DIM), 2, FP).astype(
        jnp.bfloat16)                                                      # [T, BN, FP]
    pool_tiles = jnp.stack(
        [P[t * GB:(t + 1) * GB, t * BN:(t + 1) * BN] for t in range(NUM_TILES)]
    )                                                                      # [T, GB, BN]
    # Fuse the K Chebyshev weight matrices into one lane-dense contraction matrix.
    w1_2d = pad_axis(pad_axis(w1, 1, FP), 2, HP).reshape(K * FP, HP).astype(
        jnp.bfloat16)                                                      # [K*FP, HP]
    w2_2d = pad_axis(pad_axis(w2, 1, HP), 2, OP).reshape(K * HP, OP).astype(
        jnp.bfloat16)                                                      # [K*HP, OP]
    b1_p = pad_axis(b1, 1, HP)                                             # [1, HP] f32
    b2_p = pad_axis(b2, 1, OP)                                             # [1, OP] f32

    out = chebnet_forward(L_tiles, x_tiles, pool_tiles, w1_2d, b1_p, w2_2d, b2_p,
                          K=K, valid_out=OUTPUT_DIM)
    out = jax.block_until_ready(out)

    ref = reference_forward(L_hat, x, w1, b1, w2, b2, P, K)
    assert out.shape == (NUM_GRAPHS, OUTPUT_DIM)
    assert jnp.allclose(out, ref, atol=2e-2, rtol=2e-2), (out, ref)

    print("KERNEL_OK")
</pallas_src>

<mosaic_0001>
module attributes {stable_mosaic.version = 11 : i64} {
  func.func @chebnet_kernel(%arg0: i32, %arg1: memref<1x128x128xbf16, #tpu.memory_space<vmem>>, %arg2: memref<1x128x128xbf16, #tpu.memory_space<vmem>>, %arg3: memref<1x16x128xf32, #tpu.memory_space<vmem>>, %arg4: memref<384x128xbf16, #tpu.memory_space<vmem>>, %arg5: memref<1x128xf32, #tpu.memory_space<vmem>>, %arg6: memref<384x128xbf16, #tpu.memory_space<vmem>>, %arg7: memref<1x128xf32, #tpu.memory_space<vmem>>, %arg8: memref<1x16x128xf32, #tpu.memory_space<vmem>>) attributes {dimension_semantics = [#tpu.dimension_semantics<parallel>], iteration_bounds = array<i64: 2>, scalar_prefetch = 0 : i64, scratch_operands = 0 : i64, tpu.core_type = #tpu.core_type<tc>, window_params = [{transform_indices = @transform_0, window_bounds = array<i64: 1, 128, 128>}, {transform_indices = @transform_1, window_bounds = array<i64: 1, 128, 128>}, {transform_indices = @transform_2, window_bounds = array<i64: 1, 16, 128>}, {pipeline_mode = #tpu.pipeline_mode<synchronous>, transform_indices = @transform_3, window_bounds = array<i64: 384, 128>}, {pipeline_mode = #tpu.pipeline_mode<synchronous>, transform_indices = @transform_4, window_bounds = array<i64: 1, 128>}, {pipeline_mode = #tpu.pipeline_mode<synchronous>, transform_indices = @transform_5, window_bounds = array<i64: 384, 128>}, {pipeline_mode = #tpu.pipeline_mode<synchronous>, transform_indices = @transform_6, window_bounds = array<i64: 1, 128>}, {transform_indices = @transform_7, window_bounds = array<i64: 1, 16, 128>}]} {
    %c0 = arith.constant 0 : index
    %c0_0 = arith.constant 0 : index
    %c0_1 = arith.constant 0 : index
    %0 = vector.load %arg1[%c0, %c0_0, %c0_1] : memref<1x128x128xbf16, #tpu.memory_space<vmem>>, vector<1x128x128xbf16>
    %1 = vector.shape_cast %0 : vector<1x128x128xbf16> to vector<128x128xbf16>
    %c0_2 = arith.constant 0 : index
    %c0_3 = arith.constant 0 : index
    %c0_4 = arith.constant 0 : index
    %2 = vector.load %arg2[%c0_2, %c0_3, %c0_4] : memref<1x128x128xbf16, #tpu.memory_space<vmem>>, vector<1x128x128xbf16>
    %3 = vector.shape_cast %2 : vector<1x128x128xbf16> to vector<128x128xbf16>
    %4 = arith.extf %3 : vector<128x128xbf16> to vector<128x128xf32>
    %cst = arith.constant dense<0.000000e+00> : vector<128x128xf32>
    %5 = tpu.matmul %1, %3, %cst {dimension_numbers = #tpu.dot_dimension_numbers<[1], [0], [0], [1], [0, 0, 1, 1], [], []>} : vector<128x128xbf16>, vector<128x128xbf16>, vector<128x128xf32> -> vector<128x128xf32>
    %6 = arith.truncf %5 : vector<128x128xf32> to vector<128x128xbf16>
    %7 = arith.truncf %5 : vector<128x128xf32> to vector<128x128xbf16>
    %cst_5 = arith.constant dense<0.000000e+00> : vector<128x128xf32>
    %8 = tpu.matmul %1, %7, %cst_5 {dimension_numbers = #tpu.dot_dimension_numbers<[1], [0], [0], [1], [0, 0, 1, 1], [], []>} : vector<128x128xbf16>, vector<128x128xbf16>, vector<128x128xf32> -> vector<128x128xf32>
    %cst_6 = arith.constant 2.000000e+00 : f32
    %9 = vector.broadcast %cst_6 : f32 to vector<128x128xf32>
    %10 = arith.mulf %9, %8 : vector<128x128xf32>
    %11 = arith.subf %10, %4 : vector<128x128xf32>
    %12 = arith.truncf %11 : vector<128x128xf32> to vector<128x128xbf16>
    %13 = tpu.concatenate %3, %6, %12 in 1 : vector<128x128xbf16>, vector<128x128xbf16>, vector<128x128xbf16> -> vector<128x384xbf16>
    %c0_7 = arith.constant 0 : index
    %c0_8 = arith.constant 0 : index
    %14 = vector.load %arg4[%c0_7, %c0_8] : memref<384x128xbf16, #tpu.memory_space<vmem>>, vector<384x128xbf16>
    %cst_9 = arith.constant dense<0.000000e+00> : vector<128x128xf32>
    %15 = tpu.matmul %13, %14, %cst_9 {dimension_numbers = #tpu.dot_dimension_numbers<[1], [0], [0], [1], [0, 0, 1, 1], [], []>} : vector<128x384xbf16>, vector<384x128xbf16>, vector<128x128xf32> -> vector<128x128xf32>
    %c0_10 = arith.constant 0 : index
    %c0_11 = arith.constant 0 : index
    %16 = vector.load %arg5[%c0_10, %c0_11] : memref<1x128xf32, #tpu.memory_space<vmem>>, vector<1x128xf32>
    %17 = vector.broadcast %16 : vector<1x128xf32> to vector<128x128xf32>
    %18 = arith.addf %15, %17 : vector<128x128xf32>
    %cst_12 = arith.constant 0.000000e+00 : f32
    %19 = vector.broadcast %cst_12 : f32 to vector<128x128xf32>
    %20 = arith.maximumf %18, %19 : vector<128x128xf32>
    %21 = arith.truncf %20 : vector<128x128xf32> to vector<128x128xbf16>
    %22 = arith.extf %21 : vector<128x128xbf16> to vector<128x128xf32>
    %cst_13 = arith.constant dense<0.000000e+00> : vector<128x128xf32>
    %23 = tpu.matmul %1, %21, %cst_13 {dimension_numbers = #tpu.dot_dimension_numbers<[1], [0], [0], [1], [0, 0, 1, 1], [], []>} : vector<128x128xbf16>, vector<128x128xbf16>, vector<128x128xf32> -> vector<128x128xf32>
    %24 = arith.truncf %23 : vector<128x128xf32> to vector<128x128xbf16>
    %25 = arith.truncf %23 : vector<128x128xf32> to vector<128x128xbf16>
    %cst_14 = arith.constant dense<0.000000e+00> : vector<128x128xf32>
    %26 = tpu.matmul %1, %25, %cst_14 {dimension_numbers = #tpu.dot_dimension_numbers<[1], [0], [0], [1], [0, 0, 1, 1], [], []>} : vector<128x128xbf16>, vector<128x128xbf16>, vector<128x128xf32> -> vector<128x128xf32>
    %cst_15 = arith.constant 2.000000e+00 : f32
    %27 = vector.broadcast %cst_15 : f32 to vector<128x128xf32>
    %28 = arith.mulf %27, %26 : vector<128x128xf32>
    %29 = arith.subf %28, %22 : vector<128x128xf32>
    %30 = arith.truncf %29 : vector<128x128xf32> to vector<128x128xbf16>
    %31 = tpu.concatenate %21, %24, %30 in 1 : vector<128x128xbf16>, vector<128x128xbf16>, vector<128x128xbf16> -> vector<128x384xbf16>
    %c0_16 = arith.constant 0 : index
    %c0_17 = arith.constant 0 : index
    %c0_18 = arith.constant 0 : index
    %32 = vector.load %arg3[%c0_16, %c0_17, %c0_18] : memref<1x16x128xf32, #tpu.memory_space<vmem>>, vector<1x16x128xf32>
    %33 = vector.shape_cast %32 : vector<1x16x128xf32> to vector<16x128xf32>
    %34 = arith.truncf %33 : vector<16x128xf32> to vector<16x128xbf16>
    %cst_19 = arith.constant dense<0.000000e+00> : vector<16x384xf32>
    %35 = tpu.matmul %34, %31, %cst_19 {dimension_numbers = #tpu.dot_dimension_numbers<[1], [0], [0], [1], [0, 0, 1, 1], [], []>} : vector<16x128xbf16>, vector<128x384xbf16>, vector<16x384xf32> -> vector<16x384xf32>
    %36 = arith.truncf %35 : vector<16x384xf32> to vector<16x384xbf16>
    %c0_20 = arith.constant 0 : index
    %c0_21 = arith.constant 0 : index
    %37 = vector.load %arg6[%c0_20, %c0_21] : memref<384x128xbf16, #tpu.memory_space<vmem>>, vector<384x128xbf16>
    %cst_22 = arith.constant dense<0.000000e+00> : vector<16x128xf32>
    %38 = tpu.matmul %36, %37, %cst_22 {dimension_numbers = #tpu.dot_dimension_numbers<[1], [0], [0], [1], [0, 0, 1, 1], [], []>} : vector<16x384xbf16>, vector<384x128xbf16>, vector<16x128xf32> -> vector<16x128xf32>
    %c0_23 = arith.constant 0 : index
    %c0_24 = arith.constant 0 : index
    %39 = vector.load %arg7[%c0_23, %c0_24] : memref<1x128xf32, #tpu.memory_space<vmem>>, vector<1x128xf32>
    %40 = vector.broadcast %39 : vector<1x128xf32> to vector<16x128xf32>
    %41 = arith.addf %38, %40 : vector<16x128xf32>
    %42 = tpu.iota {dimensions = array<i32: 1>} : vector<16x128xi32>
    %c4_i32 = arith.constant 4 : i32
    %43 = vector.broadcast %c4_i32 : i32 to vector<16x128xi32>
    %44 = arith.cmpi slt, %42, %43 : vector<16x128xi32>
    %cst_25 = arith.constant -1.000000e+30 : f32
    %45 = vector.broadcast %cst_25 : f32 to vector<16x128xf32>
    %46 = arith.select %44, %41, %45 : vector<16x128xi1>, vector<16x128xf32>
    %cst_26 = arith.constant dense<0xFF800000> : vector<16xf32>
    %47 = vector.multi_reduction <maximumf>, %46, %cst_26 [1] : vector<16x128xf32> to vector<16xf32>
    %48 = vector.shape_cast %47 : vector<16xf32> to vector<16x1xf32>
    %49 = vector.broadcast %48 : vector<16x1xf32> to vector<16x128xf32>
    %50 = arith.subf %46, %49 : vector<16x128xf32>
    %51 = math.exp %50 : vector<16x128xf32>
    %cst_27 = arith.constant dense<0.000000e+00> : vector<16xf32>
    %52 = vector.multi_reduction <add>, %51, %cst_27 [1] : vector<16x128xf32> to vector<16xf32>
    %53 = vector.shape_cast %52 : vector<16xf32> to vector<16x1xf32>
    %54 = math.log %53 : vector<16x1xf32>
    %55 = vector.broadcast %54 : vector<16x1xf32> to vector<16x128xf32>
    %56 = arith.subf %50, %55 : vector<16x128xf32>
    %c0_28 = arith.constant 0 : index
    %c0_29 = arith.constant 0 : index
    %c0_30 = arith.constant 0 : index
    %57 = vector.load %arg8[%c0_28, %c0_29, %c0_30] : memref<1x16x128xf32, #tpu.memory_space<vmem>>, vector<1x16x128xf32>
    %58 = vector.shape_cast %57 : vector<1x16x128xf32> to vector<16x128xf32>
    %59 = vector.shape_cast %56 : vector<16x128xf32> to vector<1x16x128xf32>
    tpu.vector_store %arg8[%c0_28, %c0_29, %c0_30], %59 {strides = array<i32>} : memref<1x16x128xf32, #tpu.memory_space<vmem>>, vector<1x16x128xf32>,
    return
  }
  func.func @transform_0(%arg0: i32) -> (i32, i32, i32) {
    %c0_i32 = arith.constant 0 : i32
    %c0_i32_0 = arith.constant 0 : i32
    %c0_i32_1 = arith.constant 0 : i32
    return %arg0, %c0_i32, %c0_i32_0 : i32, i32, i32
  }
  func.func @transform_1(%arg0: i32) -> (i32, i32, i32) {
    %c0_i32 = arith.constant 0 : i32
    %c0_i32_0 = arith.constant 0 : i32
    %c0_i32_1 = arith.constant 0 : i32
    return %arg0, %c0_i32, %c0_i32_0 : i32, i32, i32
  }
  func.func @transform_2(%arg0: i32) -> (i32, i32, i32) {
    %c0_i32 = arith.constant 0 : i32
    %c0_i32_0 = arith.constant 0 : i32
    %c0_i32_1 = arith.constant 0 : i32
    return %arg0, %c0_i32, %c0_i32_0 : i32, i32, i32
  }
  func.func @transform_3(%arg0: i32) -> (i32, i32) {
    %c0_i32 = arith.constant 0 : i32
    %c0_i32_0 = arith.constant 0 : i32
    %c0_i32_1 = arith.constant 0 : i32
    return %c0_i32, %c0_i32_0 : i32, i32
  }
  func.func @transform_4(%arg0: i32) -> (i32, i32) {
    %c0_i32 = arith.constant 0 : i32
    %c0_i32_0 = arith.constant 0 : i32
    %c0_i32_1 = arith.constant 0 : i32
    return %c0_i32, %c0_i32_0 : i32, i32
  }
  func.func @transform_5(%arg0: i32) -> (i32, i32) {
    %c0_i32 = arith.constant 0 : i32
    %c0_i32_0 = arith.constant 0 : i32
    %c0_i32_1 = arith.constant 0 : i32
    return %c0_i32, %c0_i32_0 : i32, i32
  }
  func.func @transform_6(%arg0: i32) -> (i32, i32) {
    %c0_i32 = arith.constant 0 : i32
    %c0_i32_0 = arith.constant 0 : i32
    %c0_i32_1 = arith.constant 0 : i32
    return %c0_i32, %c0_i32_0 : i32, i32
  }
  func.func @transform_7(%arg0: i32) -> (i32, i32, i32) {
    %c0_i32 = arith.constant 0 : i32
    %c0_i32_0 = arith.constant 0 : i32
    %c0_i32_1 = arith.constant 0 : i32
    return %arg0, %c0_i32, %c0_i32_0 : i32, i32, i32
  }
}

</mosaic_0001>

<bundles_post_ra>
// kernel: tpu_custom_call.1
= control target key start
LH: loop header
LB: loop body
LE: loop exit
PB: predicated region body
PF: predicated region fallthrough
CT: control target
= control target key end

     0   :  { %s3522_s0 = inlined_call_operand.hbm [shape: bf16[2,128,128], index: 0, kind: input, shape index: {}]   ;;  %s3523_s1 = inlined_call_operand.hbm [shape: bf16[2,128,128], index: 1, kind: input, shape index: {}]   ;;  %s3524_s2 = inlined_call_operand.hbm [shape: f32[2,16,128], index: 2, kind: input, shape index: {}]   ;;  %s3525_s3 = inlined_call_operand.hbm [shape: bf16[384,128], index: 3, kind: input, shape index: {}]   ;;  %s3526_s4 = inlined_call_operand.vmem [shape: f32[1,128], index: 4, kind: input, shape index: {}]   ;;  %s3527_s5 = inlined_call_operand.hbm [shape: bf16[384,128], index: 5, kind: input, shape index: {}]   ;;  %s3528_s6 = inlined_call_operand.vmem [shape: f32[1,128], index: 6, kind: input, shape index: {}]   ;;  %s3529_s7 = inlined_call_operand.hbm [shape: f32[2,16,128], index: 7, kind: output, shape index: {}]  }
   0x1   :  { %3548 = sst [smem:[#allocation20_spill]] %s3523_s1 }
   0x2   :  { %3549 = sst [smem:[#allocation21_spill]] %s3525_s3 }
   0x3   :  { %12 = vsyncpa [#allocation3], 0 }
   0x4   :  { %14 = vsyncpa [#allocation3 + $0x1], 0 }
   0x5   :  { %15 = vsyncpa [#allocation6], 0 }
   0x6   :  { %17 = vsyncpa [#allocation6 + $0x1], 0 }
   0x7   :  { %18 = vsyncpa [#allocation9], 0 }
   0x8   :  { %19 = vsyncpa [#allocation4], 0 }
   0x9   :  { %21 = vsyncpa [#allocation4 + $0x1], 0  ;;  %s2935_s24 = smov 0   ;;  %s2937_s25 = smov 0  }
   0xa   :  { %s2939_s26 = smov 0   ;;  %s2941_s27 = smov 0  }
   0xb LB: > { %3550 = sst [smem:[#allocation16_spill]] %s2874_s26  ;;  %s2956_s28 = sadd.s32 4294967295, %s2878_s27   ;;  %s2878_s27 = sphi %s2941_s27, %s3583_s27   ;;  %s2874_s26 = sphi %s2939_s26, %s3585_s26   ;;  %s2870_s25 = sphi %s2937_s25, %s3587_s25   ;;  %s2866_s24 = sphi %s2935_s24, %s3586_s24  }
   0xc   : > { %s2012_s29 = sadd.s32 4294967294, %s2878_s27   ;;  %s2960_s30 = sadd.s32 1, %s2878_s27  }
   0xd   : > { %3551 = sst [smem:[#allocation17_spill]] %s2960_s30  ;;  %s34_s8 = sadd.s32 1, %s2874_s26 }
   0xe   : > { %s31_s9 = ssub.s32 %s2878_s27, %s2960_s30  ;;  %p41_p0 = scmp.ne.s32.totalorder %s2874_s26, %s2870_s25 }
   0xf   : > { %p32_p1 = scmp.eq.s32.totalorder %s31_s9, 0  ;;  %p42_p2 = scmp.eq.s32.totalorder %s2878_s27, 0 }
  0x10   : > { %p47_p3 = scmp.ne.s32.totalorder %s2870_s25, %s2866_s24  ;;  %p3530_p4 = scmp.eq.s32.totalorder %s2956_s28, 0 }
  0x11   : > { %s2972_s10 = scalar_select %p32_p1, %s2874_s26, %s34_s8  }
  0x12   : > { %p2974_p5 = por %p42_p2, %p41_p0  ;;  %p2980_p6 = por %p3530_p4, %p47_p3 }
  0x13   : > { %3552 = sst [smem:[#allocation18_spill]] %s2972_s10  ;;  %p207_p7 = scmp.eq.s32.totalorder %s2956_s28, 1 }
  0x14   : > { %s3553_s11 = scalar_select %p2974_p5, 1, 0 }
  0x15   : > { %s3554_s12 = scalar_select %p2980_p6, 1, 0 }
  0x16   : > { %p213_p8 = scmp.eq.s32.totalorder %s2012_s29, 1  ;;  %p2013_p9 = scmp.ge.s32.totalorder %s2878_s27, 1 }
  0x17   : > { %p220_p10 = scmp.lt.s32.totalorder %s2878_s27, 3  ;;  %p2987_p11 = por %p207_p7, %p41_p0 }
  0x18   : > { %p2991_p12 = por %p213_p8, %p47_p3  ;;  %s2880_s16 = smov [#allocation8]  }
  0x19   : > { %s3555_s13 = scalar_select %p2987_p11, 1, 0 }
  0x1a   : > { %s3556_s14 = scalar_select %p2991_p12, 1, 0 }
  0x1b   : > { %p2995_p13 = pnand %p2013_p9, %p220_p10  ;;  %s232_s17 = sshll.u32 %s2880_s16, 4  ;;  %s233_s17 = int_to_ptr.vmem [resolvable:$true] %s232_s17 }
  0x1c   : > { %3557 = sst [smem:[#allocation19_spill]] %s3556_s14  ;;  %s3010_s19 = sand.u32 1, %s2874_s26  }
  0x1d   : > { %s3558_s15 = scalar_select %p2995_p13, 1, 0 }
  0x1e   : > { %p2508_p1 = pneg %p2995_p13  ;;  %s3560_s3 = sld [smem:[#allocation21_spill]] }
  0x20   : > { %p3003_p2 = pnand %p2508_p1, %p3530_p4 }
  0x22   : > { %s3559_s18 = scalar_select %p3003_p2, 1, 0 }
  0x23   : > { %p3540_p8 = pneg %p3003_p2 }
  0x24   : > { %s2658_s23 = scalar_lea.hbm %s3560_s3, 3072 }
  0x25   : > { %p2659_p7 = scmp.ne.s32.totalorder %s3560_s3, %s2658_s23  ;;  %p2665_p1 = scmp.lt.u32.totalorder %s2658_s23, %s3560_s3 }
  0x27   : > { %p2661_p9 = pnand %p3540_p8, %p2659_p7 }
  0x29   : > { %p2662_p10 = pneg %p2661_p9 }
  0x2b   : > { %p2667_p0 = pnand %p2665_p1, %p2662_p10 }
  0x2d   : > { %2670 = shalt.err (!%p2667_p0)
}
  0x2e   : > { %s2671_s20 = scalar_lea.vmem %s233_s17, 3072  ;;  %p2679_p11 = scmp.lt.s32.totalorder %s233_s17, %s233_s17 }
  0x2f   : > { %p2672_p4 = scmp.ne.s32.totalorder %s233_s17, %s2671_s20  ;;  %p2680_p6 = scmp.lt.s32.totalorder %s2671_s20, %s2671_s20 }
  0x31   : > { %p2674_p3 = pnand %p2672_p4, %p3540_p8  ;;  %p2681_p13 = por %p2680_p6, %p2679_p11 }
  0x33   : > { %p2675_p12 = pneg %p2674_p3 }
  0x35   : > { %p2682_p5 = pnand %p2681_p13, %p2675_p12 }
  0x37   : > { %2685 = shalt.err (!%p2682_p5)
}
  0x38   : > { %s3537_s21 = smov 64   ;;  %s2882_s22 = smov 4  }
  0x39   : > { %2511 = dma.hbm_to_vmem [thread:$0]  (!%p3003_p2), %s3560_s3, 3072, %s233_s17, [#allocation9], %s3537_s21, %s3537_s21, %s2882_s22  }
  0x3a   : > { %s3539_s20 = sshll.u32 %s2878_s27, 10  ;;  %p3561_p4 = scmp.ne.s32.totalorder %s3553_s11, 0 }
  0x3b   : > { %p3562_p5 = scmp.lt.s32.totalorder %s2878_s27, 2  ;;  %s286_s9 = sand.u32 1, %s2878_s27  }
  0x3c   : > { %s3564_s1 = sld [smem:[#allocation20_spill]]  ;;  %s3565_s30 = sshll.u32 %s3010_s19, 6 }
  0x3d   : > { %p3043_p6 = pnand %p3562_p5, %p3561_p4  ;;  %s290_s17 = scalar_lea.vmem [#allocation5], %s3565_s30 }
  0x3e   : > { %s297_s11 = sshll.u32 %s290_s17, 4  ;;  %s3059_s23 = scalar_lea.sflag [#allocation6], %s286_s9  ;;  %s3057_s11 = int_to_ptr.vmem [resolvable:$true] %s297_s11 }
  0x3f   : > { %s3563_s8 = scalar_select %p3043_p6, 1, 0 }
  0x40   : > { %p3065_p12 = pneg %p3043_p6 }
  0x42   : > { %s3053_s26 = scalar_lea.hbm %s3564_s1, %s3539_s20  ;;  %s2691_s30 = scalar_lea.hbm %s3564_s1, 2048 }
  0x43   : > { %s2686_s29 = scalar_lea.hbm %s3053_s26, 1024  ;;  %p2692_p3 = scmp.lt.u32.totalorder %s3053_s26, %s3564_s1 }
  0x44   : > { %p2687_p11 = scmp.ne.s32.totalorder %s3053_s26, %s2686_s29  ;;  %p2693_p7 = scmp.lt.u32.totalorder %s2691_s30, %s2686_s29 }
  0x45   : > { %s3566_s21 = scalar_select %p3065_p12, 1, 0 }
  0x46   : > { %p2689_p13 = pnand %p3065_p12, %p2687_p11  ;;  %p2694_p9 = por %p2693_p7, %p2692_p3 }
  0x47   : > { %p2695_p10 = scmp.lt.u32.totalorder %s2686_s29, %s3053_s26 }
  0x48   : > { %p2690_p0 = pneg %p2689_p13 }
  0x49   : > { %p2696_p1 = por %p2695_p10, %p2694_p9 }
  0x4b   : > { %p2697_p4 = pnand %p2696_p1, %p2690_p0 }
  0x4d   : > { %2700 = shalt.err (!%p2697_p4)
}
  0x4e   : > { %s2701_s9 = scalar_lea.vmem %s3057_s11, 1024  ;;  %s2883_s10 = smov [#allocation5]  }
  0x4f   : > { %p2702_p5 = scmp.ne.s32.totalorder %s3057_s11, %s2701_s9  ;;  %s2706_s16 = sshll.u32 %s2883_s10, 4  ;;  %s2707_s16 = int_to_ptr.vmem [resolvable:$false] %s2706_s16 }
  0x50   : > { %s2708_s20 = scalar_lea.vmem %s2707_s16, 2048  ;;  %p2709_p8 = scmp.lt.s32.totalorder %s3057_s11, %s2707_s16 }
  0x51   : > { %p2704_p11 = pnand %p2702_p5, %p3065_p12  ;;  %p2710_p2 = scmp.lt.s32.totalorder %s2708_s20, %s2701_s9 }
  0x53   : > { %p2705_p13 = pneg %p2704_p11  ;;  %p2711_p3 = por %p2710_p2, %p2709_p8 }
  0x55   : > { %p2712_p7 = pnand %p2711_p3, %p2705_p13 }
  0x57   : > { %2715 = shalt.err (!%p2712_p7)
}
  0x58   : > { %s3567_s29 = smov 64   ;;  %s2884_s30 = smov [#allocation10]  }
  0x59   : > { %2521 = dma.hbm_to_vmem [thread:$0]  (!%p3043_p6), %s3053_s26, 1024, %s3057_s11, %s3059_s23, %s3567_s29, %s3567_s29, %s2882_s22  }
  0x5a   : > { %s248_s17 = sshll.u32 %s2884_s30, 4  ;;  %s2716_s9 = scalar_lea.hbm %s3527_s5, 3072  ;;  %s249_s17 = int_to_ptr.vmem [resolvable:$true] %s248_s17 }
  0x5b   : > { %p2717_p2 = scmp.ne.s32.totalorder %s3527_s5, %s2716_s9  ;;  %p3568_p8 = scmp.ne.s32.totalorder %s3559_s18, 0 }
  0x5c   : > { %p2723_p1 = scmp.lt.u32.totalorder %s2716_s9, %s3527_s5 }
  0x5d   : > { %p3569_p0 = pneg %p3568_p8 }
  0x5f   : > { %p2719_p9 = pnand %p2717_p2, %p3569_p0 }
  0x61   : > { %p2720_p10 = pneg %p2719_p9 }
  0x63   : > { %p2725_p4 = pnand %p2723_p1, %p2720_p10 }
  0x65   : > { %2728 = shalt.err (!%p2725_p4)
}
  0x66   : > { %s2729_s26 = scalar_lea.vmem %s249_s17, 3072  ;;  %p3570_p11 = pmov %p3569_p0 }
  0x67   : > { %p2730_p5 = scmp.ne.s32.totalorder %s249_s17, %s2729_s26  ;;  %p2737_p7 = scmp.lt.s32.totalorder %s249_s17, %s249_s17 }
  0x68   : > { %p2738_p6 = scmp.lt.s32.totalorder %s2729_s26, %s2729_s26 }
  0x69   : > { %p2732_p13 = pnand %p2730_p5, %p3570_p11 }
  0x6a   : > { %p2739_p12 = por %p2738_p6, %p2737_p7 }
  0x6b   : > { %p2733_p3 = pneg %p2732_p13 }
  0x6d   : > { %p2740_p0 = pnand %p2739_p12, %p2733_p3 }
  0x6f   : > { %2743 = shalt.err (!%p2740_p0)
}
  0x70   : > { %2514 = dma.hbm_to_vmem [thread:$0]  (!%p3568_p8), %s3527_s5, 3072, %s249_s17, [#allocation9], %s3567_s29, %s3567_s29, %s2882_s22  }
  0x71   : > { %s3571_s14 = sshll.u32 %s2878_s27, 10  ;;  %s3572_s9 = sshll.u32 %s3010_s19, 6 }
  0x72   : > { %s3120_s10 = scalar_lea.hbm %s3522_s0, %s3571_s14  ;;  %s269_s18 = scalar_lea.vmem [#allocation2], %s3572_s9 }
  0x73   : > { %s276_s16 = sshll.u32 %s269_s18, 4  ;;  %s2023_s20 = sshll.u32 %s3010_s19, 4  ;;  %s3124_s16 = int_to_ptr.vmem [resolvable:$true] %s276_s16 }
  0x74   : > { %s266_s26 = scalar_lea.sflag [#allocation3], %s3010_s19  ;;  %s2744_s1 = scalar_lea.hbm %s3120_s10, 1024 }
  0x75   : > { %p2745_p6 = scmp.ne.s32.totalorder %s3120_s10, %s2744_s1  ;;  %p3573_p12 = scmp.ne.s32.totalorder %s3566_s21, 0 }
  0x76   : > { %s2749_s14 = scalar_lea.hbm %s3522_s0, 2048  ;;  %p2750_p9 = scmp.lt.u32.totalorder %s3120_s10, %s3522_s0 }
  0x77   : > { %p2747_p2 = pnand %p2745_p6, %p3573_p12  ;;  %p2751_p10 = scmp.lt.u32.totalorder %s2749_s14, %s2744_s1 }
  0x78   : > { %p2753_p4 = scmp.lt.u32.totalorder %s2744_s1, %s3120_s10 }
  0x79   : > { %p2748_p8 = pneg %p2747_p2  ;;  %p2752_p1 = por %p2751_p10, %p2750_p9 }
  0x7b   : > { %p2754_p5 = por %p2753_p4, %p2752_p1 }
  0x7d   : > { %p2755_p11 = pnand %p2754_p5, %p2748_p8 }
  0x7f   : > { %2758 = shalt.err (!%p2755_p11)
}
  0x80   : > { %s2759_s9 = scalar_lea.vmem %s3124_s16, 1024  ;;  %s2885_s18 = smov [#allocation2]  }
  0x81   : > { %p2760_p13 = scmp.ne.s32.totalorder %s3124_s16, %s2759_s9  ;;  %s2764_s17 = sshll.u32 %s2885_s18, 4  ;;  %s2765_s17 = int_to_ptr.vmem [resolvable:$false] %s2764_s17 }
  0x82   : > { %s2766_s3 = scalar_lea.vmem %s2765_s17, 2048  ;;  %p2767_p0 = scmp.lt.s32.totalorder %s3124_s16, %s2765_s17 }
  0x83   : > { %p2762_p3 = pnand %p2760_p13, %p3573_p12  ;;  %p2768_p6 = scmp.lt.s32.totalorder %s2766_s3, %s2759_s9 }
  0x85   : > { %p2763_p7 = pneg %p2762_p3  ;;  %p2769_p2 = por %p2768_p6, %p2767_p0 }
  0x87   : > { %p2770_p9 = pnand %p2769_p2, %p2763_p7 }
  0x89   : > { %2773 = shalt.err (!%p2770_p9)
}
  0x8a   : > { %p3574_p8 = scmp.ne.s32.totalorder %s3563_s8, 0  ;;  %s2106_s1 = sshll.u32 %s2878_s27, 8 }
  0x8b   : > { %s3158_s30 = scalar_lea.hbm %s3524_s2, %s2106_s1  ;;  %s311_s9 = scalar_lea.vmem [#allocation7], %s2023_s20 }
  0x8c   : > { %2518 = dma.hbm_to_vmem [thread:$0]  (!%p3574_p8), %s3120_s10, 1024, %s3124_s16, %s266_s26, %s3567_s29, %s3567_s29, %s2882_s22  }
  0x8d   : > { %s318_s18 = sshll.u32 %s311_s9, 4  ;;  %s2774_s17 = scalar_lea.hbm %s3158_s30, 256  ;;  %s3162_s18 = int_to_ptr.vmem [resolvable:$true] %s318_s18 }
  0x8e   : > { %p2775_p10 = scmp.ne.s32.totalorder %s3158_s30, %s2774_s17  ;;  %s2779_s10 = scalar_lea.hbm %s3524_s2, 512 }
  0x8f   : > { %p2780_p5 = scmp.lt.u32.totalorder %s3158_s30, %s3524_s2  ;;  %p2781_p11 = scmp.lt.u32.totalorder %s2779_s10, %s2774_s17 }
  0x90   : > { %p2777_p1 = pnand %p2775_p10, %p3573_p12  ;;  %p2783_p3 = scmp.lt.u32.totalorder %s2774_s17, %s3158_s30 }
  0x91   : > { %p2782_p13 = por %p2781_p11, %p2780_p5 }
  0x92   : > { %p2778_p4 = pneg %p2777_p1 }
  0x93   : > { %p2784_p7 = por %p2783_p3, %p2782_p13 }
  0x95   : > { %p2785_p0 = pnand %p2784_p7, %p2778_p4 }
  0x97   : > { %2788 = shalt.err (!%p2785_p0)
}
  0x98   : > { %s2789_s19 = scalar_lea.vmem %s3162_s18, 256  ;;  %s2886_s20 = smov [#allocation7]  }
  0x99   : > { %p2790_p6 = scmp.ne.s32.totalorder %s3162_s18, %s2789_s19  ;;  %s2794_s3 = sshll.u32 %s2886_s20, 4  ;;  %s2795_s3 = int_to_ptr.vmem [resolvable:$false] %s2794_s3 }
  0x9a   : > { %s2796_s1 = scalar_lea.vmem %s2795_s3, 512  ;;  %p2797_p10 = scmp.lt.s32.totalorder %s3162_s18, %s2795_s3 }
  0x9b   : > { %p2792_p2 = pnand %p2790_p6, %p3573_p12  ;;  %p2798_p1 = scmp.lt.s32.totalorder %s2796_s1, %s2789_s19 }
  0x9d   : > { %p2793_p9 = pneg %p2792_p2  ;;  %p2799_p5 = por %p2798_p1, %p2797_p10 }
  0x9f   : > { %p2800_p11 = pnand %p2799_p5, %p2793_p9 }
  0xa1   : > { %2803 = shalt.err (!%p2800_p11)
}
  0xa2   : > { %s2887_s14 = smov 128   ;;  %s2888_s11 = smov 8  }
  0xa3   : > { %2524 = dma.hbm_to_vmem [thread:$0]  (!%p3574_p8), %s3158_s30, 256, %s3162_s18, %s3059_s23, %s2887_s14, %s2887_s14, %s2888_s11  }
  0xa4   : > { %p3575_p12 = scmp.ne.s32.totalorder %s3558_s15, 0 }
  0xa5   : > { %s3189_s21 = sand.u32 (!%p3575_p12), 1, %s2870_s25   ;;  %p3576_p4 = scmp.ne.s32.totalorder (!%p3575_p12), %s3554_s12, 0 }
  0xa6   : > { %330 = sbr.rel (%p3575_p12) target bundleno = 2202 (0x89a), region = 48  ;;  %s2027_s9 = sshll.u32 (!%p3575_p12), %s3189_s21, 6 }
  0xa7   : > { %s333_s17 = scalar_lea.sflag (!%p3575_p12), [#allocation3], %s3189_s21  ;;  %s3193_s22 = scalar_lea.vmem (!%p3575_p12), [#allocation2], %s2027_s9 }
  0xad   : > { %2849 = dma.done.wait (%p3576_p4), %s333_s17, 1024  }
  0xae   : > { %2851 = vsyncadd (%p3576_p4), %s333_s17, 4294966272  ;;  %s341_s8 = sand.u32 1, %s2956_s28   ;;  %s345_s23 = scalar_lea.vmem [#allocation5], %s2027_s9 }
  0xaf   : > { %s342_s15 = scalar_lea.sflag [#allocation6], %s341_s8 }
  0xb0   : > { %2853 = dma.done.wait (%p3576_p4), %s342_s15, 1280  }
  0xb1   : > { %2855 = vsyncadd (%p3576_p4), %s342_s15, 4294966016  ;;  %s2029_s30 = sshll.u32 %s3189_s21, 4  ;;  %p3577_p8 = scmp.eq.s32.totalorder %s2956_s28, 0 }
  0xb2   : > { %s3207_s18 = scalar_lea.vmem [#allocation7], %s2029_s30 }
  0xb3   : > { %2857 = dma.done.wait (%p3577_p8), [#allocation9], 6144   ;;  %p3578_p13 = pmov %p3577_p8 }
  0xb4   : > { %v3213_v0 = vld [vmem:[%s345_s23] sm:$0xff]   ;;  %v3215_v1 = vld [vmem:[%s345_s23 + $0x8] sm:$0xff]   ;;  %v3217_v2 = vld [vmem:[%s345_s23 + $0x10] sm:$0xff]   ;;  %vm2891_vm0 = vmmov 0   ;;  %s402_s26 = scalar_lea.vmem [#allocation11], %s2029_s30  ;;  %s2107_s20 = sshll.u32 %s2956_s28, 8 }
  0xb5   : > { %2859 = vsyncadd (%p3578_p13), [#allocation9], 4294961152  ;;  %2292 = vmatprep.subr.bf16.mxu0 %v3213_v0  ;;  %v3221_v3 = vld [vmem:[%s3193_s22] sm:$0xff]   ;;  %v3226_v4 = vld [vmem:[%s345_s23 + $0x18] sm:$0xff]   ;;  %s1877_s19 = sshll.u32 %s402_s26, 4  ;;  %s3478_s14 = scalar_lea.hbm %s3529_s7, %s2107_s20  ;;  %s3473_s19 = int_to_ptr.vmem [resolvable:$true] %s1877_s19 }
  0xb6   : > { %2293 = vmatpush3.bf16.msra.mxu0 %v3213_v0  ;;  %2308 = vmatprep.mubr.bf16.mxu0 %v3221_v3  ;;  %v3231_v5 = vld [vmem:[%s345_s23 + $0x20] sm:$0xff]   ;;  %v3235_v6 = vld [vmem:[%s345_s23 + $0x28] sm:$0xff]   ;;  %v3239_v7 = vld [vmem:[%s345_s23 + $0x30] sm:$0xff]   ;;  %s1864_s11 = scalar_lea.sflag [#allocation4], %s3189_s21  ;;  %s2804_s9 = scalar_lea.vmem %s3473_s19, 256 }
  0xb7   : > { %2294 = vmatprep.subr.bf16.mxu0 %v3215_v1  ;;  %2340 = vmatprep.mubr.bf16.mxu1 %v3221_v3  ;;  %v3243_v8 = vld [vmem:[%s345_s23 + $0x38] sm:$0xff]   ;;  %v2594_v9 = vld [vmem:[#allocation8 + $0x40] sm:$0xff]   ;;  %v3250_v10 = vld [vmem:[%s3193_s22 + $0x8] sm:$0xff]   ;;  %p2805_p3 = scmp.ne.s32.totalorder %s3473_s19, %s2804_s9  ;;  %p3579_p7 = scmp.ne.s32.totalorder %s3555_s13, 0 }
  0xb8   : > { %v3253_v11 = vld [vmem:[%s3193_s22 + $0x10] sm:$0xff]   ;;  %v2595_v12 = vld [vmem:[#allocation8] sm:$0xff]   ;;  %v2596_v13 = vld [vmem:[#allocation8 + $0x48] sm:$0xff]   ;;  %s2892_s28 = smov [#allocation11]  }
  0xb9   : > { %v2597_v14 = vld [vmem:[#allocation8 + $0x8] sm:$0xff]   ;;  %v2598_v15 = vld [vmem:[#allocation8 + $0x50] sm:$0xff]   ;;  %v3259_v16 = vld [vmem:[%s3193_s22 + $0x18] sm:$0xff]   ;;  %p2806_p0 = pnand %p2805_p3, %p3579_p7  ;;  %s2808_s17 = sshll.u32 %s2892_s28, 4  ;;  %s2809_s17 = int_to_ptr.vmem [resolvable:$false] %s2808_s17 }
  0xba   : > { %2295 = vmatpush3.bf16.msra.mxu0 %v3215_v1  ;;  %v3262_v17 = vld [vmem:[%s3193_s22 + $0x20] sm:$0xff]   ;;  %v2599_v18 = vld [vmem:[#allocation8 + $0x10] sm:$0xff]   ;;  %v2600_v19 = vld [vmem:[#allocation8 + $0x58] sm:$0xff]   ;;  %p2811_p2 = scmp.lt.s32.totalorder %s3473_s19, %s2809_s17 }
  0xbb   : > { %2296 = vmatprep.subr.bf16.mxu0 %v3217_v2  ;;  %v2601_v20 = vld [vmem:[#allocation8 + $0x18] sm:$0xff]   ;;  %v2602_v21 = vld [vmem:[#allocation8 + $0x60] sm:$0xff]   ;;  %v3267_v22 = vld [vmem:[%s3193_s22 + $0x28] sm:$0xff]   ;;  %p2807_p6 = pneg %p2806_p0 }
  0xbc   : > { %v3270_v23 = vld [vmem:[%s3193_s22 + $0x30] sm:$0xff]   ;;  %v2603_v24 = vld [vmem:[#allocation8 + $0x20] sm:$0xff]   ;;  %v2604_v25 = vld [vmem:[#allocation8 + $0x68] sm:$0xff]  }
  0xbd   : > { %v2605_v26 = vld [vmem:[#allocation8 + $0x28] sm:$0xff]   ;;  %v2606_v27 = vld [vmem:[#allocation8 + $0x70] sm:$0xff]   ;;  %v3275_v28 = vld [vmem:[%s3193_s22 + $0x38] sm:$0xff]   ;;  %s2810_s22 = scalar_lea.vmem %s2809_s17, 512 }
  0xbe   : > { %2297 = vmatpush3.bf16.msra.mxu0 %v3217_v2  ;;  %v2607_v29 = vld [vmem:[#allocation8 + $0x30] sm:$0xff]   ;;  %v2608_v30 = vld [vmem:[#allocation8 + $0x78] sm:$0xff]   ;;  %v2610_v56 = vld [vmem:[#allocation8 + $0x80] sm:$0xff]   ;;  %p2812_p9 = scmp.lt.s32.totalorder %s2810_s22, %s2804_s9 }
  0xbf   : > { %2298 = vmatprep.subr.bf16.mxu0 %v3226_v4  ;;  %v2609_v31 = vld [vmem:[#allocation8 + $0x38] sm:$0xff]   ;;  %v2611_v57 = vld [vmem:[#allocation8 + $0x88] sm:$0xff]   ;;  %v2612_v58 = vld [vmem:[#allocation8 + $0x90] sm:$0xff]  }
  0xc0   : > { %v2613_v59 = vld [vmem:[#allocation8 + $0x98] sm:$0xff]   ;;  %v2614_v60 = vld [vmem:[#allocation8 + $0xa0] sm:$0xff]   ;;  %v2615_v61 = vld [vmem:[#allocation8 + $0xa8] sm:$0xff]   ;;  %p2813_p10 = por %p2812_p9, %p2811_p2 }
  0xc1   : > { %v2616_v62 = vld [vmem:[#allocation8 + $0xb0] sm:$0xff]   ;;  %v2617_v63 = vld [vmem:[#allocation8 + $0xb8] sm:$0xff]  }
  0xc2   : > { %2299 = vmatpush3.bf16.msra.mxu0 %v3226_v4  ;;  %p2814_p1 = pnand %p2813_p10, %p2807_p6 }
  0xc3   : > { %2300 = vmatprep.subr.bf16.mxu0 %v3231_v5 }
  0xc6   : > { %2301 = vmatpush3.bf16.msra.mxu0 %v3231_v5 }
  0xc7   : > { %2302 = vmatprep.subr.bf16.mxu0 %v3235_v6 }
  0xca   : > { %2303 = vmatpush3.bf16.msra.mxu0 %v3235_v6 }
  0xcb   : > { %2304 = vmatprep.subr.bf16.mxu0 %v3239_v7 }
  0xce   : > { %2305 = vmatpush3.bf16.msra.mxu0 %v3239_v7 }
  0xcf   : > { %2306 = vmatprep.subr.bf16.mxu0 %v3243_v8 }
  0xd2   : > { %2307 = vmatpush3.bf16.msra.mxu0 %v3243_v8 }
  0xd3   : > { %2140 = vmatprep.subr.bf16.mxu0 %v2594_v9 }
  0xd5   : > { %2309 = vmatmul.mubr.bf16.vlgmr.msra.gmra.mrb[0].mxu0 %v3250_v10 }
  0xd6   : > { %2312 = vmatprep.mubr.bf16.mxu0 %v3253_v11  ;;  %2141 = vmatpush3.bf16.msra.mxu0 %v2595_v12 }
  0xd7   : > { %2142 = vmatprep.subr.bf16.mxu0 %v2596_v13 }
  0xda   : > { %2143 = vmatpush3.bf16.msra.mxu0 %v2597_v14 }
  0xdb   : > { %2144 = vmatprep.subr.bf16.mxu0 %v2598_v15 }
  0xdd   : > { %2313 = vmatmul.mubr.bf16.gmra.mrb[4].mxu0 %v3259_v16 }
  0xde   : > { %2316 = vmatprep.mubr.bf16.mxu0 %v3262_v17  ;;  %2145 = vmatpush3.bf16.msra.mxu0 %v2599_v18 }
  0xdf   : > { %2146 = vmatprep.subr.bf16.mxu0 %v2600_v19 }
  0xe2   : > { %2147 = vmatpush3.bf16.msra.mxu0 %v2601_v20 }
  0xe3   : > { %2148 = vmatprep.subr.bf16.mxu0 %v2602_v21 }
  0xe5   : > { %2317 = vmatmul.mubr.bf16.gmra.mrb[8].mxu0 %v3267_v22 }
  0xe6   : > { %2320 = vmatprep.mubr.bf16.mxu0 %v3270_v23  ;;  %2149 = vmatpush3.bf16.msra.mxu0 %v2603_v24 }
  0xe7   : > { %2150 = vmatprep.subr.bf16.mxu0 %v2604_v25 }
  0xea   : > { %2151 = vmatpush3.bf16.msra.mxu0 %v2605_v26 }
  0xeb   : > { %2152 = vmatprep.subr.bf16.mxu0 %v2606_v27 }
  0xed   : > { %2321 = vmatmul.mubr.bf16.gmra.mrb[12].mxu0 %v3275_v28 }
  0xee   : > { %2153 = vmatpush3.bf16.msra.mxu0 %v2607_v29 }
  0xef   : > { %2154 = vmatprep.subr.bf16.mxu0 %v2608_v30 }
  0xf2   : > { %2155 = vmatpush3.bf16.msra.mxu0 %v2609_v31 }
 0x1a8   : > { %v2310_v32 = vpop.f32.mrb[0].mxu0 }
 0x1a9   : > { %v582_v33 = vpop.f32.mrb[1].mxu0 }
 0x1aa   : > { %v2311_v34 = vpop.f32.mrb[2].mxu0 }
 0x1ab   : > { %v646_v35 = vpack.c.bf16 %v2311_v34, %v2310_v32  ;;  %v585_v36 = vpop.f32.mrb[3].mxu0 }
 0x1ac   : > { %v645_v37 = vpack.c.bf16 %v585_v36, %v582_v33 }
 0x1ae   : > { %2324 = vmatprep.subr.bf16.mxu1 %v645_v37  ;;  %1021 = vmatprep.mubr.bf16.mxu0 %v645_v37 }
 0x1af   : > { %2325 = vmatpush3.bf16.msra.mxu1 %v645_v37  ;;  %1022 = vmatmul.mubr.bf16.vlgmr.msra.gmra.mrb[16].mxu0 %v3213_v0 }
 0x1b0   : > { %v2314_v38 = vpop.f32.mrb[4].mxu0  ;;  %2326 = vmatprep.subr.bf16.mxu1 %v646_v35  ;;  %1029 = vmatprep.mubr.bf16.mxu0 %v646_v35 }
 0x1b1   : > { %v598_v39 = vpop.f32.mrb[5].mxu0 }
 0x1b2   : > { %v2315_v40 = vpop.f32.mrb[6].mxu0 }
 0x1b3   : > { %v648_v41 = vpack.c.bf16 %v2315_v40, %v2314_v38  ;;  %v601_v42 = vpop.f32.mrb[7].mxu0  ;;  %2327 = vmatpush3.bf16.msra.mxu1 %v646_v35 }
 0x1b4   : > { %v647_v43 = vpack.c.bf16 %v601_v42, %v598_v39 }
 0x1b6   : > { %2328 = vmatprep.subr.bf16.mxu1 %v647_v43 }
 0x1b7   : > { %2329 = vmatpush3.bf16.msra.mxu1 %v647_v43  ;;  %1030 = vmatmul.mubr.bf16.gmra.mrb[20].mxu0 %v3215_v1 }
 0x1b8   : > { %v2318_v44 = vpop.f32.mrb[8].mxu0  ;;  %2330 = vmatprep.subr.bf16.mxu1 %v648_v41  ;;  %1037 = vmatprep.mubr.bf16.mxu0 %v647_v43 }
 0x1b9   : > { %v614_v45 = vpop.f32.mrb[9].mxu0 }
 0x1ba   : > { %v2319_v46 = vpop.f32.mrb[10].mxu0 }
 0x1bb   : > { %v650_v47 = vpack.c.bf16 %v2319_v46, %v2318_v44  ;;  %v617_v48 = vpop.f32.mrb[11].mxu0  ;;  %2331 = vmatpush3.bf16.msra.mxu1 %v648_v41  ;;  %v439_v44 = vunpack.c.h.bf16 %v3215_v1  ;;  %v436_v46 = vunpack.c.l.bf16 %v3213_v0 }
 0x1bc   : > { %v649_v49 = vpack.c.bf16 %v617_v48, %v614_v45 }
 0x1be   : > { %2332 = vmatprep.subr.bf16.mxu1 %v649_v49 }
 0x1bf   : > { %2333 = vmatpush3.bf16.msra.mxu1 %v649_v49  ;;  %1038 = vmatmul.mubr.bf16.gmra.mrb[24].mxu0 %v3217_v2 }
 0x1c0   : > { %v2322_v50 = vpop.f32.mrb[12].mxu0  ;;  %2334 = vmatprep.subr.bf16.mxu1 %v650_v47  ;;  %1045 = vmatprep.mubr.bf16.mxu0 %v648_v41  ;;  %v438_v41 = vunpack.c.l.bf16 %v3215_v1 }
 0x1c1   : > { %v630_v51 = vpop.f32.mrb[13].mxu0 }
 0x1c2   : > { %v2323_v52 = vpop.f32.mrb[14].mxu0 }
 0x1c3   : > { %v652_v53 = vpack.c.bf16 %v2323_v52, %v2322_v50  ;;  %v633_v54 = vpop.f32.mrb[15].mxu0  ;;  %2335 = vmatpush3.bf16.msra.mxu1 %v650_v47 }
 0x1c4   : > { %v651_v55 = vpack.c.bf16 %v633_v54, %v630_v51 }
 0x1c6   : > { %2336 = vmatprep.subr.bf16.mxu1 %v651_v55 }
 0x1c7   : > { %2337 = vmatpush3.bf16.msra.mxu1 %v651_v55  ;;  %1046 = vmatmul.mubr.bf16.gmra.mrb[28].mxu0 %v3226_v4 }
 0x1c8   : > { %2338 = vmatprep.subr.bf16.mxu1 %v652_v53  ;;  %1053 = vmatprep.mubr.bf16.mxu0 %v649_v49  ;;  %v437_v49 = vunpack.c.h.bf16 %v3213_v0 }
 0x1cb   : > { %2339 = vmatpush3.bf16.msra.mxu1 %v652_v53 }
 0x1cc   : > { %2356 = vmatprep.subr.bf16.mxu1 %v2610_v56 }
 0x1ce   : > { %2341 = vmatmul.mubr.bf16.vlgmr.msra.gmra.mrb[0].mxu1 %v3250_v10 }
 0x1cf   : > { %1054 = vmatmul.mubr.bf16.gmra.mrb[32].mxu0 %v3231_v5  ;;  %2344 = vmatprep.mubr.bf16.mxu1 %v3253_v11 }
 0x1d0   : > { %1061 = vmatprep.mubr.bf16.mxu0 %v650_v47  ;;  %2357 = vmatpush3.bf16.msra.mxu1 %v2610_v56 }
 0x1d1   : > { %2358 = vmatprep.subr.bf16.mxu1 %v2611_v57 }
 0x1d4   : > { %2359 = vmatpush3.bf16.msra.mxu1 %v2611_v57 }
 0x1d5   : > { %2360 = vmatprep.subr.bf16.mxu1 %v2612_v58 }
 0x1d6   : > { %2345 = vmatmul.mubr.bf16.gmra.mrb[4].mxu1 %v3259_v16 }
 0x1d7   : > { %1062 = vmatmul.mubr.bf16.gmra.mrb[36].mxu0 %v3235_v6  ;;  %2348 = vmatprep.mubr.bf16.mxu1 %v3262_v17 }
 0x1d8   : > { %1069 = vmatprep.mubr.bf16.mxu0 %v651_v55  ;;  %2361 = vmatpush3.bf16.msra.mxu1 %v2612_v58 }
 0x1d9   : > { %2362 = vmatprep.subr.bf16.mxu1 %v2613_v59 }
 0x1dc   : > { %2363 = vmatpush3.bf16.msra.mxu1 %v2613_v59 }
 0x1dd   : > { %2364 = vmatprep.subr.bf16.mxu1 %v2614_v60 }
 0x1de   : > { %2349 = vmatmul.mubr.bf16.gmra.mrb[8].mxu1 %v3267_v22 }
 0x1df   : > { %1070 = vmatmul.mubr.bf16.gmra.mrb[40].mxu0 %v3239_v7  ;;  %2352 = vmatprep.mubr.bf16.mxu1 %v3270_v23 }
 0x1e0   : > { %1077 = vmatprep.mubr.bf16.mxu0 %v652_v53  ;;  %2365 = vmatpush3.bf16.msra.mxu1 %v2614_v60 }
 0x1e1   : > { %2366 = vmatprep.subr.bf16.mxu1 %v2615_v61 }
 0x1e4   : > { %2367 = vmatpush3.bf16.msra.mxu1 %v2615_v61 }
 0x1e5   : > { %2368 = vmatprep.subr.bf16.mxu1 %v2616_v62 }
 0x1e6   : > { %2353 = vmatmul.mubr.bf16.gmra.mrb[12].mxu1 %v3275_v28 }
 0x1e7   : > { %1078 = vmatmul.mubr.bf16.gmra.mrb[44].mxu0 %v3243_v8 }
 0x1e8   : > { %2436 = vmatprep.mubr.bf16.mxu0 %v3221_v3  ;;  %2369 = vmatpush3.bf16.msra.mxu1 %v2616_v62 }
 0x1e9   : > { %2370 = vmatprep.subr.bf16.mxu1 %v2617_v63 }
 0x1ec   : > { %2371 = vmatpush3.bf16.msra.mxu1 %v2617_v63 }
 0x282   : > { %v2156_v9 = vpop.f32.mrb[16].mxu0 }
 0x283   : > { %v2157_v12 = vpop.f32.mrb[17].mxu0 }
 0x284   : > { %v3294_v13 = vadd.f32 %v2157_v12, %v2156_v9  ;;  %v2159_v14 = vpop.f32.mrb[18].mxu0  ;;  %v442_v9 = vunpack.c.l.bf16 %v3226_v4 }
 0x285   : > { %v2160_v15 = vpop.f32.mrb[19].mxu0 }
 0x286   : > { %v3296_v18 = vadd.f32 %v2160_v15, %v2159_v14  ;;  %v443_v14 = vunpack.c.h.bf16 %v3226_v4  ;;  %v440_v15 = vunpack.c.l.bf16 %v3217_v2  ;;  %v446_v4 = vunpack.c.l.bf16 %v3235_v6 }
 0x28a   : > { %v2162_v19 = vpop.f32.mrb[20].mxu0 }
 0x28b   : > { %v2163_v20 = vpop.f32.mrb[21].mxu0 }
 0x28c   : > { %v3298_v21 = vadd.f32 %v2163_v20, %v2162_v19  ;;  %v2165_v24 = vpop.f32.mrb[22].mxu0 }
 0x28d   : > { %v2166_v25 = vpop.f32.mrb[23].mxu0 }
 0x28e   : > { %v3300_v26 = vadd.f32 %v2166_v25, %v2165_v24  ;;  %v441_v24 = vunpack.c.h.bf16 %v3217_v2 }
 0x292   : > { %v2168_v27 = vpop.f32.mrb[24].mxu0 }
 0x293   : > { %v2169_v29 = vpop.f32.mrb[25].mxu0 }
 0x294   : > { %v3302_v30 = vadd.f32 %v2169_v29, %v2168_v27  ;;  %v2171_v31 = vpop.f32.mrb[26].mxu0 }
 0x295   : > { %v2172_v32 = vpop.f32.mrb[27].mxu0 }
 0x296   : > { %v3304_v33 = vadd.f32 %v2172_v32, %v2171_v31 }
 0x29a   : > { %v2174_v34 = vpop.f32.mrb[28].mxu0 }
 0x29b   : > { %v2175_v35 = vpop.f32.mrb[29].mxu0 }
 0x29c   : > { %v3306_v36 = vadd.f32 %v2175_v35, %v2174_v34  ;;  %v2177_v37 = vpop.f32.mrb[30].mxu0 }
 0x29d   : > { %v2178_v38 = vpop.f32.mrb[31].mxu0 }
 0x29e   : > { %v3308_v39 = vadd.f32 %v2178_v38, %v2177_v37 }
 0x2a1   : > { %v2342_v40 = vpop.f32.mrb[0].mxu1 }
 0x2a2   : > { %v752_v42 = vmul.f32 2.0, %v2342_v40  ;;  %v687_v43 = vpop.f32.mrb[1].mxu1  ;;  %v2180_v45 = vpop.f32.mrb[32].mxu0 }
 0x2a3   : > { %v750_v47 = vmul.f32 2.0, %v687_v43  ;;  %v2343_v48 = vpop.f32.mrb[2].mxu1  ;;  %v2181_v50 = vpop.f32.mrb[33].mxu0  ;;  %v447_v43 = vunpack.c.h.bf16 %v3235_v6  ;;  %v450_v6 = vunpack.c.l.bf16 %v3243_v8 }
 0x2a4   : > { %v753_v51 = vmul.f32 2.0, %v2343_v48  ;;  %v690_v52 = vpop.f32.mrb[3].mxu1  ;;  %v3314_v53 = vadd.f32 %v2181_v50, %v2180_v45  ;;  %v2183_v54 = vpop.f32.mrb[34].mxu0  ;;  %v768_v57 = vsub.f32 %v752_v42, %v438_v41 }
 0x2a5   : > { %v751_v55 = vmul.f32 2.0, %v690_v52  ;;  %v2184_v56 = vpop.f32.mrb[35].mxu0  ;;  %v766_v1 = vsub.f32 %v750_v47, %v436_v46  ;;  %v445_v46 = vunpack.c.h.bf16 %v3231_v5 }
 0x2a6   : > { %v769_v58 = vsub.f32 %v753_v51, %v439_v44  ;;  %v3316_v59 = vadd.f32 %v2184_v56, %v2183_v54  ;;  %v444_v44 = vunpack.c.l.bf16 %v3231_v5 }
 0x2a7   : > { %v767_v60 = vsub.f32 %v751_v55, %v437_v49 }
 0x2a8   : > { %v783_v61 = vpack.c.bf16 %v769_v58, %v768_v57 }
 0x2a9   : > { %v2346_v62 = vpop.f32.mrb[4].mxu1  ;;  %v782_v63 = vpack.c.bf16 %v767_v60, %v766_v1  ;;  %v451_v60 = vunpack.c.h.bf16 %v3243_v8 }
 0x2aa   : > { %v756_v0 = vmul.f32 2.0, %v2346_v62  ;;  %v703_v12 = vpop.f32.mrb[5].mxu1  ;;  %v2186_v8 = vpop.f32.mrb[36].mxu0 }
 0x2ab   : > { %v754_v19 = vmul.f32 2.0, %v703_v12  ;;  %v2347_v20 = vpop.f32.mrb[6].mxu1  ;;  %2372 = vmatprep.mubr.bf16.mxu1 %v782_v63  ;;  %v449_v63 = vunpack.c.h.bf16 %v3239_v7 }
 0x2ac   : > { %v757_v25 = vmul.f32 2.0, %v2347_v20  ;;  %v706_v27 = vpop.f32.mrb[7].mxu1  ;;  %2373 = vmatmul.mubr.bf16.vlgmr.msra.gmra.mrb[16].mxu1 %v783_v61  ;;  %v772_v31 = vsub.f32 %v756_v0, %v442_v9  ;;  %v448_v61 = vunpack.c.l.bf16 %v3239_v7 }
 0x2ad   : > { %v755_v29 = vmul.f32 2.0, %v706_v27  ;;  %v770_v34 = vsub.f32 %v754_v19, %v440_v15  ;;  %v2187_v27 = vpop.f32.mrb[37].mxu0 }
 0x2ae   : > { %v773_v32 = vsub.f32 %v757_v25, %v443_v14 }
 0x2af   : > { %v771_v35 = vsub.f32 %v755_v29, %v441_v24  ;;  %v2189_v29 = vpop.f32.mrb[38].mxu0 }
 0x2b0   : > { %v785_v37 = vpack.c.bf16 %v773_v32, %v772_v31  ;;  %v2188_v31 = vadd.f32 %v2187_v27, %v2186_v8  ;;  %v2190_v32 = vpop.f32.mrb[39].mxu0 }
 0x2b1   : > { %v2350_v38 = vpop.f32.mrb[8].mxu1  ;;  %v784_v40 = vpack.c.bf16 %v771_v35, %v770_v34  ;;  %v2191_v7 = vadd.f32 %v2190_v32, %v2189_v29 }
 0x2b2   : > { %v760_v41 = vmul.f32 2.0, %v2350_v38  ;;  %v719_v42 = vpop.f32.mrb[9].mxu1  ;;  %v2192_v34 = vpop.f32.mrb[40].mxu0 }
 0x2b3   : > { %v758_v2 = vmul.f32 2.0, %v719_v42  ;;  %v2351_v45 = vpop.f32.mrb[10].mxu1  ;;  %2376 = vmatprep.mubr.bf16.mxu1 %v784_v40  ;;  %v2193_v35 = vpop.f32.mrb[41].mxu0 }
 0x2b4   : > { %v761_v47 = vmul.f32 2.0, %v2351_v45  ;;  %v722_v48 = vpop.f32.mrb[11].mxu1  ;;  %2377 = vmatmul.mubr.bf16.gmra.mrb[20].mxu1 %v785_v37  ;;  %v776_v50 = vsub.f32 %v760_v41, %v446_v4  ;;  %v2195_v37 = vpop.f32.mrb[42].mxu0  ;;  %v3331_v38 = vadd.f32 %v2193_v35, %v2192_v34  ;;  %v3340_v45 = vld [vmem:[%s3526_s4] ss:$0 sm:$0xff] }
 0x2b5   : > { %v759_v49 = vmul.f32 2.0, %v722_v48  ;;  %v774_v52 = vsub.f32 %v758_v2, %v444_v44  ;;  %v2196_v40 = vpop.f32.mrb[43].mxu0  ;;  %v1024_v48 = vadd.f32 %v3294_v13, %v3340_v45  ;;  %v1048_v13 = vadd.f32 %v3306_v36, %v3340_v45 }
 0x2b6   : > { %v777_v51 = vsub.f32 %v761_v47, %v447_v43  ;;  %v3333_v4 = vadd.f32 %v2196_v40, %v2195_v37  ;;  %v1056_v29 = vadd.f32 %v3314_v53, %v3340_v45  ;;  %v1067_v35 = vadd.f32 %v2191_v7, %v3340_v45 }
 0x2b7   : > { %v775_v54 = vsub.f32 %v759_v49, %v445_v46  ;;  %v1032_v46 = vadd.f32 %v3298_v21, %v3340_v45 }
 0x2b8   : > { %v787_v55 = vpack.c.bf16 %v777_v51, %v776_v50  ;;  %v1035_v51 = vadd.f32 %v3300_v26, %v3340_v45 }
 0x2b9   : > { %v2354_v56 = vpop.f32.mrb[12].mxu1  ;;  %v786_v57 = vpack.c.bf16 %v775_v54, %v774_v52 }
 0x2ba   : > { %v764_v58 = vmul.f32 2.0, %v2354_v56  ;;  %v735_v1 = vpop.f32.mrb[13].mxu1  ;;  %v2198_v41 = vpop.f32.mrb[44].mxu0 }
 0x2bb   : > { %v762_v5 = vmul.f32 2.0, %v735_v1  ;;  %v2355_v62 = vpop.f32.mrb[14].mxu1  ;;  %2380 = vmatprep.mubr.bf16.mxu1 %v786_v57  ;;  %v2199_v42 = vpop.f32.mrb[45].mxu0 }
 0x2bc   : > { %v765_v9 = vmul.f32 2.0, %v2355_v62  ;;  %v738_v0 = vpop.f32.mrb[15].mxu1  ;;  %2381 = vmatmul.mubr.bf16.gmra.mrb[24].mxu1 %v787_v55  ;;  %v780_v14 = vsub.f32 %v764_v58, %v450_v6  ;;  %v2200_v43 = vadd.f32 %v2199_v42, %v2198_v41  ;;  %v2201_v44 = vpop.f32.mrb[46].mxu0  ;;  %v1027_v55 = vadd.f32 %v3296_v18, %v3340_v45 }
 0x2bd   : > { %v763_v12 = vmul.f32 2.0, %v738_v0  ;;  %v778_v19 = vsub.f32 %v762_v5, %v448_v61  ;;  %v2202_v2 = vpop.f32.mrb[47].mxu0  ;;  %v1040_v62 = vadd.f32 %v3302_v30, %v3340_v45  ;;  %v1059_v41 = vadd.f32 %v3316_v59, %v3340_v45 }
 0x2be   : > { %v781_v15 = vsub.f32 %v765_v9, %v451_v60  ;;  %v1051_v9 = vadd.f32 %v3308_v39, %v3340_v45  ;;  %v1064_v39 = vadd.f32 %v2188_v31, %v3340_v45 }
 0x2bf   : > { %v779_v20 = vsub.f32 %v763_v12, %v449_v63 }
 0x2c0   : > { %v789_v24 = vpack.c.bf16 %v781_v15, %v780_v14  ;;  %v1043_v14 = vadd.f32 %v3304_v33, %v3340_v45 }
 0x2c1   : > { %v788_v25 = vpack.c.bf16 %v779_v20, %v778_v19 }
 0x2c3   : > { %2384 = vmatprep.mubr.bf16.mxu1 %v788_v25 }
 0x2c4   : > { %2385 = vmatmul.mubr.bf16.gmra.mrb[28].mxu1 %v789_v24 }
 0x2c5   : > { %2404 = vmatprep.mubr.bf16.mxu1 %v3221_v3  ;;  %v3335_v3 = vadd.f32 %v2202_v2, %v2201_v44 }
 0x2c7   : > { %v1083_v59 = vadd.f32 %v3335_v3, %v3340_v45 }
 0x37f   : > { %v2374_v47 = vpop.f32.mrb[16].mxu1 }
 0x380   : > { %v1129_v49 = vadd.f32 %v2374_v47, %v1032_v46  ;;  %v1120_v50 = vpop.f32.mrb[17].mxu1  ;;  %v1080_v46 = vadd.f32 %v2200_v43, %v3340_v45  ;;  %v1075_v43 = vadd.f32 %v3333_v4, %v3340_v45 }
 0x381   : > { %v1121_v52 = vadd.f32 %v1120_v50, %v1024_v48  ;;  %v2375_v54 = vpop.f32.mrb[18].mxu1 }
 0x382   : > { %v1132_v56 = vadd.f32 %v2375_v54, %v1035_v51  ;;  %v1123_v57 = vpop.f32.mrb[19].mxu1  ;;  %v1185_v58 = vmax.f32 %v1129_v49, 0.0  ;;  %v1072_v51 = vadd.f32 %v3331_v38, %v3340_v45 }
 0x383   : > { %v1124_v6 = vadd.f32 %v1123_v57, %v1027_v55  ;;  %v1183_v21 = vmax.f32 %v1121_v52, 0.0 }
 0x384   : > { %v1186_v1 = vmax.f32 %v1132_v56, 0.0 }
 0x385   : > { %v1184_v60 = vmax.f32 %v1124_v6, 0.0 }
 0x386   : > { %v3350_v61 = vpack.c.bf16 %v1186_v1, %v1185_v58 }
 0x387   : > { %v3354_v5 = vpack.c.bf16 %v1184_v60, %v1183_v21  ;;  %v2378_v26 = vpop.f32.mrb[20].mxu1 }
 0x388   : > { %v1145_v63 = vadd.f32 %v2378_v26, %v1048_v13  ;;  %v1136_v18 = vpop.f32.mrb[21].mxu1 }
 0x389   : > { %v1137_v0 = vadd.f32 %v1136_v18, %v1040_v62  ;;  %v2379_v12 = vpop.f32.mrb[22].mxu1  ;;  %2388 = vmatprep.subr.bf16.mxu1 %v3354_v5 }
 0x38a   : > { %v1148_v15 = vadd.f32 %v2379_v12, %v1051_v9  ;;  %v1139_v36 = vpop.f32.mrb[23].mxu1  ;;  %2389 = vmatpush3.bf16.msra.mxu1 %v3354_v5  ;;  %v1189_v30 = vmax.f32 %v1145_v63, 0.0 }
 0x38b   : > { %v1140_v19 = vadd.f32 %v1139_v36, %v1043_v14  ;;  %2390 = vmatprep.subr.bf16.mxu1 %v3350_v61  ;;  %v1187_v24 = vmax.f32 %v1137_v0, 0.0 }
 0x38c   : > { %v1190_v20 = vmax.f32 %v1148_v15, 0.0 }
 0x38d   : > { %v1188_v25 = vmax.f32 %v1140_v19, 0.0 }
 0x38e   : > { %v3365_v8 = vpack.c.bf16 %v1190_v20, %v1189_v30  ;;  %2391 = vmatpush3.bf16.msra.mxu1 %v3350_v61 }
 0x38f   : > { %v3369_v27 = vpack.c.bf16 %v1188_v25, %v1187_v24  ;;  %v2382_v33 = vpop.f32.mrb[24].mxu1 }
 0x390   : > { %v1161_v32 = vadd.f32 %v2382_v33, %v1064_v39  ;;  %v1152_v34 = vpop.f32.mrb[25].mxu1 }
 0x391   : > { %v1153_v37 = vadd.f32 %v1152_v34, %v1056_v29  ;;  %v2383_v40 = vpop.f32.mrb[26].mxu1  ;;  %2392 = vmatprep.subr.bf16.mxu1 %v3369_v27 }
 0x392   : > { %v1164_v42 = vadd.f32 %v2383_v40, %v1067_v35  ;;  %v1155_v44 = vpop.f32.mrb[27].mxu1  ;;  %2393 = vmatpush3.bf16.msra.mxu1 %v3369_v27  ;;  %v1193_v2 = vmax.f32 %v1161_v32, 0.0  ;;  %v2889_v40 = vmov 0.0  }
 0x393   : > { %v1156_v31 = vadd.f32 %v1155_v44, %v1059_v41  ;;  %2394 = vmatprep.subr.bf16.mxu1 %v3365_v8  ;;  %v1191_v47 = vmax.f32 %v1153_v37, 0.0  ;;  %v1465_v41 = vld [vmem:[%s3207_s18] sm:$0xff] }
 0x394   : > { %v1194_v53 = vmax.f32 %v1164_v42, 0.0  ;;  %v1466_v42 = vld [vmem:[%s3207_s18 + $0x8] sm:$0xff] }
 0x395   : > { %v1192_v7 = vmax.f32 %v1156_v31, 0.0  ;;  %v3428_v44 = vpack.c.bf16 %v1466_v42, %v1465_v41  ;;  %v2626_v31 = vld [vmem:[#allocation10 + $0x58] sm:$0xff]  }
 0x396   : > { %v3380_v48 = vpack.c.bf16 %v1194_v53, %v1193_v2  ;;  %2395 = vmatpush3.bf16.msra.mxu1 %v3365_v8  ;;  %v2627_v2 = vld [vmem:[#allocation10 + $0x18] sm:$0xff]   ;;  %v2629_v53 = vld [vmem:[#allocation10 + $0x60] sm:$0xff]  }
 0x397   : > { %v3385_v49 = vpack.c.bf16 %v1192_v7, %v1191_v47  ;;  %v2386_v50 = vpop.f32.mrb[28].mxu1  ;;  %v2632_v47 = vld [vmem:[#allocation10 + $0x68] sm:$0xff]  }
 0x398   : > { %v1177_v52 = vadd.f32 %v2386_v50, %v1080_v46  ;;  %v1168_v54 = vpop.f32.mrb[29].mxu1  ;;  %v2630_v46 = vld [vmem:[#allocation10 + $0x20] sm:$0xff]   ;;  %v2633_v7 = vld [vmem:[#allocation10 + $0x28] sm:$0xff]   ;;  %v2636_v50 = vld [vmem:[#allocation10 + $0x30] sm:$0xff]  }
 0x399   : > { %v1169_v55 = vadd.f32 %v1168_v54, %v1072_v51  ;;  %v2387_v56 = vpop.f32.mrb[30].mxu1  ;;  %2396 = vmatprep.subr.bf16.mxu1 %v3385_v49  ;;  %v2638_v51 = vld [vmem:[#allocation10 + $0x78] sm:$0xff]  }
 0x39a   : > { %v1180_v57 = vadd.f32 %v2387_v56, %v1083_v59  ;;  %v1171_v6 = vpop.f32.mrb[31].mxu1  ;;  %2397 = vmatpush3.bf16.msra.mxu1 %v3385_v49  ;;  %v1197_v58 = vmax.f32 %v1177_v52, 0.0  ;;  %v2635_v59 = vld [vmem:[#allocation10 + $0x70] sm:$0xff]   ;;  %v2639_v52 = vld [vmem:[#allocation10 + $0x38] sm:$0xff]  }
 0x39b   : > { %v1172_v3 = vadd.f32 %v1171_v6, %v1075_v43  ;;  %2398 = vmatprep.subr.bf16.mxu1 %v3380_v48  ;;  %v1195_v21 = vmax.f32 %v1169_v55, 0.0  ;;  %v1209_v6 = vunpack.c.l.bf16 %v3350_v61 }
 0x39c   : > { %v1198_v1 = vmax.f32 %v1180_v57, 0.0 }
 0x39d   : > { %v1196_v38 = vmax.f32 %v1172_v3, 0.0  ;;  %v1210_v3 = vunpack.c.h.bf16 %v3350_v61 }
 0x39e   : > { %v3394_v60 = vpack.c.bf16 %v1198_v1, %v1197_v58  ;;  %2399 = vmatpush3.bf16.msra.mxu1 %v3380_v48 }
 0x39f   : > { %v3397_v13 = vpack.c.bf16 %v1196_v38, %v1195_v21  ;;  %v1207_v21 = vunpack.c.l.bf16 %v3354_v5  ;;  %v1208_v38 = vunpack.c.h.bf16 %v3354_v5 }
 0x3a1   : > { %2400 = vmatprep.subr.bf16.mxu1 %v3397_v13 }
 0x3a2   : > { %2401 = vmatpush3.bf16.msra.mxu1 %v3397_v13 }
 0x3a3   : > { %2402 = vmatprep.subr.bf16.mxu1 %v3394_v60 }
 0x3a6   : > { %2403 = vmatpush3.bf16.msra.mxu1 %v3394_v60 }
 0x3a9   : > { %2405 = vmatmul.mubr.bf16.vlgmr.msra.gmra.mrb[32].mxu1 %v3250_v10 }
 0x3aa   : > { %2408 = vmatprep.mubr.bf16.mxu1 %v3253_v11 }
 0x3b1   : > { %2409 = vmatmul.mubr.bf16.gmra.mrb[36].mxu1 %v3259_v16 }
 0x3b2   : > { %2412 = vmatprep.mubr.bf16.mxu1 %v3262_v17 }
 0x3b9   : > { %2413 = vmatmul.mubr.bf16.gmra.mrb[40].mxu1 %v3267_v22 }
 0x3ba   : > { %2416 = vmatprep.mubr.bf16.mxu1 %v3270_v23 }
 0x3c1   : > { %2417 = vmatmul.mubr.bf16.gmra.mrb[44].mxu1 %v3275_v28 }
 0x47c   : > { %v2406_v4 = vpop.f32.mrb[32].mxu1 }
 0x47d   : > { %v1257_v45 = vpop.f32.mrb[33].mxu1 }
 0x47e   : > { %v2407_v26 = vpop.f32.mrb[34].mxu1 }
 0x47f   : > { %v1321_v62 = vpack.c.bf16 %v2407_v26, %v2406_v4  ;;  %v1260_v63 = vpop.f32.mrb[35].mxu1 }
 0x480   : > { %v1320_v18 = vpack.c.bf16 %v1260_v63, %v1257_v45 }
 0x482   : > { %2420 = vmatprep.subr.bf16.mxu0 %v1320_v18  ;;  %1468 = vmatprep.subr.bf16.mxu1 %v1320_v18 }
 0x483   : > { %2421 = vmatpush3.bf16.msra.mxu0 %v1320_v18  ;;  %1469 = vmatpush1.bf16.msra.mxu1 %v3354_v5  ;;  %v1211_v5 = vunpack.c.l.bf16 %v3369_v27 }
 0x484   : > { %v2410_v9 = vpop.f32.mrb[36].mxu1  ;;  %2422 = vmatprep.subr.bf16.mxu0 %v1321_v62  ;;  %1470 = vmatprep.subr.bf16.mxu1 %v1321_v62 }
 0x485   : > { %v1273_v0 = vpop.f32.mrb[37].mxu1 }
 0x486   : > { %v2411_v12 = vpop.f32.mrb[38].mxu1 }
 0x487   : > { %v1323_v14 = vpack.c.bf16 %v2411_v12, %v2410_v9  ;;  %v1276_v15 = vpop.f32.mrb[39].mxu1  ;;  %2423 = vmatpush3.bf16.msra.mxu0 %v1321_v62  ;;  %1471 = vmatpush1.bf16.msra.mxu1 %v3350_v61  ;;  %v1213_v61 = vunpack.c.l.bf16 %v3365_v8 }
 0x488   : > { %v1322_v36 = vpack.c.bf16 %v1276_v15, %v1273_v0 }
 0x48a   : > { %2424 = vmatprep.subr.bf16.mxu0 %v1322_v36  ;;  %1472 = vmatprep.subr.bf16.mxu1 %v1322_v36 }
 0x48b   : > { %2425 = vmatpush3.bf16.msra.mxu0 %v1322_v36  ;;  %1473 = vmatpush1.bf16.msra.mxu1 %v3369_v27 }
 0x48c   : > { %v2414_v19 = vpop.f32.mrb[40].mxu1  ;;  %2426 = vmatprep.subr.bf16.mxu0 %v1323_v14  ;;  %1474 = vmatprep.subr.bf16.mxu1 %v1323_v14 }
 0x48d   : > { %v1289_v30 = vpop.f32.mrb[41].mxu1 }
 0x48e   : > { %v2415_v20 = vpop.f32.mrb[42].mxu1 }
 0x48f   : > { %v1325_v24 = vpack.c.bf16 %v2415_v20, %v2414_v19  ;;  %v1292_v25 = vpop.f32.mrb[43].mxu1  ;;  %2427 = vmatpush3.bf16.msra.mxu0 %v1323_v14  ;;  %1475 = vmatpush1.bf16.msra.mxu1 %v3365_v8  ;;  %v1214_v19 = vunpack.c.h.bf16 %v3365_v8 }
 0x490   : > { %v1324_v39 = vpack.c.bf16 %v1292_v25, %v1289_v30 }
 0x492   : > { %2428 = vmatprep.subr.bf16.mxu0 %v1324_v39  ;;  %1476 = vmatprep.subr.bf16.mxu1 %v1324_v39 }
 0x493   : > { %2429 = vmatpush3.bf16.msra.mxu0 %v1324_v39  ;;  %1477 = vmatpush1.bf16.msra.mxu1 %v3385_v49 }
 0x494   : > { %v2418_v33 = vpop.f32.mrb[44].mxu1  ;;  %2430 = vmatprep.subr.bf16.mxu0 %v1325_v24  ;;  %1478 = vmatprep.subr.bf16.mxu1 %v1325_v24 }
 0x495   : > { %v1305_v29 = vpop.f32.mrb[45].mxu1 }
 0x496   : > { %v2419_v32 = vpop.f32.mrb[46].mxu1 }
 0x497   : > { %v1327_v34 = vpack.c.bf16 %v2419_v32, %v2418_v33  ;;  %v1308_v35 = vpop.f32.mrb[47].mxu1  ;;  %2431 = vmatpush3.bf16.msra.mxu0 %v1325_v24  ;;  %1479 = vmatpush1.bf16.msra.mxu1 %v3380_v48  ;;  %v1212_v24 = vunpack.c.h.bf16 %v3369_v27  ;;  %v1218_v27 = vunpack.c.h.bf16 %v3380_v48 }
 0x498   : > { %v1326_v37 = vpack.c.bf16 %v1308_v35, %v1305_v29 }
 0x49a   : > { %2432 = vmatprep.subr.bf16.mxu0 %v1326_v37  ;;  %1480 = vmatprep.subr.bf16.mxu1 %v1326_v37 }
 0x49b   : > { %2433 = vmatpush3.bf16.msra.mxu0 %v1326_v37  ;;  %1481 = vmatpush1.bf16.msra.mxu1 %v3397_v13 }
 0x49c   : > { %2434 = vmatprep.subr.bf16.mxu0 %v1327_v34  ;;  %1482 = vmatprep.subr.bf16.mxu1 %v1327_v34 }
 0x49f   : > { %2435 = vmatpush3.bf16.msra.mxu0 %v1327_v34  ;;  %1483 = vmatpush1.bf16.msra.mxu1 %v3394_v60 }
 0x4a0   : > { %2452 = vmatprep.subr.bf16.mxu0 %v2889_v40 }
 0x4a2   : > { %2437 = vmatmul.mubr.bf16.vlgmr.msra.gmra.mrb[48].mxu0 %v3250_v10  ;;  %v2890_v10 = vmov 0  }
 0x4a3   : > { %2440 = vmatprep.mubr.bf16.mxu0 %v3253_v11  ;;  %1500 = vmatprep.mubr.bf16.mxu1 %v2890_v10  ;;  %v2618_v11 = vld [vmem:[#allocation10 + $0x40] sm:$0xff]  }
 0x4a4   : > { %1501 = vmatmul.mubr.bf16.vlgmr.msra.gmra.mrb[48].mxu1 %v3428_v44  ;;  %2261 = vmatprep.subr.bf16.mxu1 %v2618_v11  ;;  %v1217_v11 = vunpack.c.l.bf16 %v3380_v48 }
 0x4aa   : > { %2441 = vmatmul.mubr.bf16.gmra.mrb[52].mxu0 %v3259_v16  ;;  %v2619_v16 = vld [vmem:[#allocation10] sm:$0xff]  }
 0x4ab   : > { %2444 = vmatprep.mubr.bf16.mxu0 %v3262_v17  ;;  %v2620_v17 = vld [vmem:[#allocation10 + $0x48] sm:$0xff]   ;;  %2262 = vmatpush3.bf16.msra.mxu1 %v2619_v16 }
 0x4ac   : > { %2263 = vmatprep.subr.bf16.mxu1 %v2620_v17 }
 0x4b2   : > { %2445 = vmatmul.mubr.bf16.gmra.mrb[56].mxu0 %v3267_v22  ;;  %v2621_v22 = vld [vmem:[#allocation10 + $0x8] sm:$0xff]  }
 0x4b3   : > { %2448 = vmatprep.mubr.bf16.mxu0 %v3270_v23  ;;  %v2623_v23 = vld [vmem:[#allocation10 + $0x50] sm:$0xff]   ;;  %2264 = vmatpush3.bf16.msra.mxu1 %v2621_v22  ;;  %v1215_v22 = vunpack.c.l.bf16 %v3385_v49 }
 0x4b4   : > { %2265 = vmatprep.subr.bf16.mxu1 %v2623_v23  ;;  %v1216_v23 = vunpack.c.h.bf16 %v3385_v49  ;;  %v1222_v49 = vunpack.c.h.bf16 %v3394_v60 }
 0x4ba   : > { %2449 = vmatmul.mubr.bf16.gmra.mrb[60].mxu0 %v3275_v28  ;;  %v2624_v28 = vld [vmem:[#allocation10 + $0x10] sm:$0xff]  }
 0x4bb   : > { %2468 = vmatprep.mubr.msk.bf16.mxu0 %vm2891_vm0, %v2889_v40  ;;  %2266 = vmatpush3.bf16.msra.mxu1 %v2624_v28 }
 0x4bc   : > { %2267 = vmatprep.subr.bf16.mxu1 %v2626_v31 }
 0x4bf   : > { %2268 = vmatpush3.bf16.msra.mxu1 %v2627_v2 }
 0x4c0   : > { %2269 = vmatprep.subr.bf16.mxu1 %v2629_v53 }
 0x4c3   : > { %2270 = vmatpush3.bf16.msra.mxu1 %v2630_v46 }
 0x4c4   : > { %2271 = vmatprep.subr.bf16.mxu1 %v2632_v47 }
 0x4c7   : > { %2272 = vmatpush3.bf16.msra.mxu1 %v2633_v7 }
 0x4c8   : > { %2273 = vmatprep.subr.bf16.mxu1 %v2635_v59 }
 0x4cb   : > { %2274 = vmatpush3.bf16.msra.mxu1 %v2636_v50 }
 0x4cc   : > { %2275 = vmatprep.subr.bf16.mxu1 %v2638_v51 }
 0x4cf   : > { %2276 = vmatpush3.bf16.msra.mxu1 %v2639_v52 }
 0x575   : > { %v2438_v54 = vpop.f32.mrb[48].mxu0 }
 0x576   : > { %v1427_v55 = vmul.f32 2.0, %v2438_v54  ;;  %v1362_v56 = vpop.f32.mrb[49].mxu0  ;;  %v1221_v54 = vunpack.c.l.bf16 %v3394_v60  ;;  %v2622_v60 = vld [vmem:[#allocation10 + $0x80] sm:$0xff]  }
 0x577   : > { %v1425_v43 = vmul.f32 2.0, %v1362_v56  ;;  %v2439_v57 = vpop.f32.mrb[50].mxu0 }
 0x578   : > { %v1428_v58 = vmul.f32 2.0, %v2439_v57  ;;  %v1365_v1 = vpop.f32.mrb[51].mxu0  ;;  %v1443_v45 = vsub.f32 %v1427_v55, %v1209_v6  ;;  %v1220_v57 = vunpack.c.h.bf16 %v3397_v13 }
 0x579   : > { %v1426_v4 = vmul.f32 2.0, %v1365_v1  ;;  %v1441_v62 = vsub.f32 %v1425_v43, %v1207_v21  ;;  %v1219_v43 = vunpack.c.l.bf16 %v3397_v13  ;;  %v2625_v13 = vld [vmem:[#allocation10 + $0x88] sm:$0xff]  }
 0x57a   : > { %v1444_v26 = vsub.f32 %v1428_v58, %v1210_v3 }
 0x57b   : > { %v1442_v63 = vsub.f32 %v1426_v4, %v1208_v38 }
 0x57c   : > { %v1458_v18 = vpack.c.bf16 %v1444_v26, %v1443_v45  ;;  %v2628_v45 = vld [vmem:[#allocation10 + $0x90] sm:$0xff]   ;;  %v2631_v26 = vld [vmem:[#allocation10 + $0x98] sm:$0xff]  }
 0x57d   : > { %v1457_v9 = vpack.c.bf16 %v1442_v63, %v1441_v62  ;;  %v2442_v0 = vpop.f32.mrb[52].mxu0  ;;  %v2634_v62 = vld [vmem:[#allocation10 + $0xa0] sm:$0xff]   ;;  %v2640_v63 = vld [vmem:[#allocation10 + $0xb0] sm:$0xff]  }
 0x57e   : > { %v1431_v12 = vmul.f32 2.0, %v2442_v0  ;;  %v1378_v14 = vpop.f32.mrb[53].mxu0 }
 0x57f   : > { %v1429_v15 = vmul.f32 2.0, %v1378_v14  ;;  %v2443_v36 = vpop.f32.mrb[54].mxu0  ;;  %2453 = vmatpush3.bf16.msra.mxu0 %v1457_v9 }
 0x580   : > { %v1432_v30 = vmul.f32 2.0, %v2443_v36  ;;  %v1381_v20 = vpop.f32.mrb[55].mxu0  ;;  %2454 = vmatprep.subr.bf16.mxu0 %v2889_v40  ;;  %v1447_v39 = vsub.f32 %v1431_v12, %v1213_v61  ;;  %v2641_v36 = vld [vmem:[#allocation10 + $0xb8] sm:$0xff]  }
 0x581   : > { %v1430_v25 = vmul.f32 2.0, %v1381_v20  ;;  %v1445_v29 = vsub.f32 %v1429_v15, %v1211_v5 }
 0x582   : > { %v1448_v33 = vsub.f32 %v1432_v30, %v1214_v19 }
 0x583   : > { %v1446_v32 = vsub.f32 %v1430_v25, %v1212_v24  ;;  %2455 = vmatpush3.bf16.msra.mxu0 %v1458_v18  ;;  %v1502_v18 = vpop.f32.mrb[48].mxu1 }
 0x584   : > { %v1460_v34 = vpack.c.bf16 %v1448_v33, %v1447_v39  ;;  %2456 = vmatprep.subr.bf16.mxu0 %v2889_v40  ;;  %v1504_v9 = vpop.f32.mrb[49].mxu1 }
 0x585   : > { %v1459_v35 = vpack.c.bf16 %v1446_v32, %v1445_v29  ;;  %v2446_v37 = vpop.f32.mrb[56].mxu0  ;;  %v1506_v0 = vpop.f32.mrb[50].mxu1  ;;  %v1836_v32 = vlaneseq }
 0x586   : > { %v1435_v8 = vmul.f32 2.0, %v2446_v37  ;;  %v1394_v41 = vpop.f32.mrb[57].mxu0  ;;  %v1552_v12 = vpack.c.bf16 %v1506_v0, %v1502_v18  ;;  %v1508_v14 = vpop.f32.mrb[51].mxu1 }
 0x587   : > { %v1433_v42 = vmul.f32 2.0, %v1394_v41  ;;  %v2447_v10 = vpop.f32.mrb[58].mxu0  ;;  %2457 = vmatpush3.bf16.msra.mxu0 %v1459_v35  ;;  %v1553_v15 = vpack.c.bf16 %v1508_v14, %v1504_v9  ;;  %v1837_v35 = vand.u32 127, %v1836_v32 }
 0x588   : > { %v1436_v16 = vmul.f32 2.0, %v2447_v10  ;;  %v1397_v17 = vpop.f32.mrb[59].mxu0  ;;  %2458 = vmatprep.subr.bf16.mxu0 %v2889_v40  ;;  %v1451_v31 = vsub.f32 %v1435_v8, %v1217_v11 }
 0x589   : > { %v1434_v28 = vmul.f32 2.0, %v1397_v17  ;;  %v1449_v53 = vsub.f32 %v1433_v42, %v1215_v22  ;;  %1786 = vmatprep.mubr.bf16.mxu1 %v1553_v15  ;;  %vm1838_vm1 = vcmp.lt.s32.totalorder %v1837_v35, 4 }
 0x58a   : > { %v1452_v2 = vsub.f32 %v1436_v16, %v1218_v27  ;;  %1787 = vmatmul.mubr.bf16.vlgmr.msra.gmra.mrb[52].mxu1 %v1552_v12 }
 0x58b   : > { %v1450_v46 = vsub.f32 %v1434_v28, %v1216_v23  ;;  %2459 = vmatpush3.bf16.msra.mxu0 %v1460_v34  ;;  %v2074_v34 = vld [vmem:[%s3528_s6] ss:$0 sm:$0xff] }
 0x58c   : > { %v1462_v47 = vpack.c.bf16 %v1452_v2, %v1451_v31  ;;  %2460 = vmatprep.subr.bf16.mxu0 %v2889_v40 }
 0x58d   : > { %v1461_v7 = vpack.c.bf16 %v1450_v46, %v1449_v53  ;;  %v2450_v59 = vpop.f32.mrb[60].mxu0 }
 0x58e   : > { %v1439_v48 = vmul.f32 2.0, %v2450_v59  ;;  %v1410_v50 = vpop.f32.mrb[61].mxu0 }
 0x58f   : > { %v1437_v51 = vmul.f32 2.0, %v1410_v50  ;;  %v2451_v52 = vpop.f32.mrb[62].mxu0  ;;  %2461 = vmatpush3.bf16.msra.mxu0 %v1461_v7 }
 0x590   : > { %v1440_v55 = vmul.f32 2.0, %v2451_v52  ;;  %v1413_v56 = vpop.f32.mrb[63].mxu0  ;;  %2462 = vmatprep.subr.bf16.mxu0 %v2889_v40  ;;  %v1455_v3 = vsub.f32 %v1439_v48, %v1221_v54 }
 0x591   : > { %v1438_v6 = vmul.f32 2.0, %v1413_v56  ;;  %v1453_v1 = vsub.f32 %v1437_v51, %v1219_v43 }
 0x592   : > { %v1456_v58 = vsub.f32 %v1440_v55, %v1222_v49 }
 0x593   : > { %v1454_v21 = vsub.f32 %v1438_v6, %v1220_v57  ;;  %2463 = vmatpush3.bf16.msra.mxu0 %v1462_v47 }
 0x594   : > { %v1464_v38 = vpack.c.bf16 %v1456_v58, %v1455_v3  ;;  %2464 = vmatprep.subr.bf16.mxu0 %v2889_v40 }
 0x595   : > { %v1463_v4 = vpack.c.bf16 %v1454_v21, %v1453_v1 }
 0x597   : > { %2465 = vmatpush3.bf16.msra.mxu0 %v1463_v4 }
 0x598   : > { %2466 = vmatprep.subr.bf16.mxu0 %v2889_v40 }
 0x59b   : > { %2467 = vmatpush3.bf16.msra.mxu0 %v1464_v38 }
 0x59c   : > { %2472 = vmatprep.subr.bf16.mxu0 %v2889_v40 }
 0x59e   : > { %2469 = vmatmul.mubr.bf16.vlgmr.msra.gmra.mrb[64].mxu0 %v3428_v44  ;;  %v2637_v44 = vld [vmem:[#allocation10 + $0xa8] sm:$0xff]  }
 0x59f   : > { %2473 = vmatpush3.bf16.msra.mxu0 %v2622_v60  ;;  %2488 = vmatprep.mubr.msk.bf16.mxu0 %vm2891_vm0, %v2889_v40 }
 0x5a0   : > { %2474 = vmatprep.subr.bf16.mxu0 %v2889_v40 }
 0x5a3   : > { %2475 = vmatpush3.bf16.msra.mxu0 %v2625_v13 }
 0x5a4   : > { %2476 = vmatprep.subr.bf16.mxu0 %v2889_v40 }
 0x5a7   : > { %2477 = vmatpush3.bf16.msra.mxu0 %v2628_v45 }
 0x5a8   : > { %2478 = vmatprep.subr.bf16.mxu0 %v2889_v40 }
 0x5ab   : > { %2479 = vmatpush3.bf16.msra.mxu0 %v2631_v26 }
 0x5ac   : > { %2480 = vmatprep.subr.bf16.mxu0 %v2889_v40 }
 0x5af   : > { %2481 = vmatpush3.bf16.msra.mxu0 %v2634_v62 }
 0x5b0   : > { %2482 = vmatprep.subr.bf16.mxu0 %v2889_v40 }
 0x5b3   : > { %2483 = vmatpush3.bf16.msra.mxu0 %v2637_v44 }
 0x5b4   : > { %2484 = vmatprep.subr.bf16.mxu0 %v2889_v40 }
 0x5b7   : > { %2485 = vmatpush3.bf16.msra.mxu0 %v2640_v63 }
 0x5b8   : > { %2486 = vmatprep.subr.bf16.mxu0 %v2889_v40 }
 0x5bb   : > { %2487 = vmatpush3.bf16.msra.mxu0 %v2641_v36 }
 0x65d   : > { %v2277_v24 = vpop.f32.mrb[52].mxu1 }
 0x65e   : > { %v2278_v25 = vpop.f32.mrb[53].mxu1 }
 0x65f   : > { %v2279_v39 = vadd.f32 %v2278_v25, %v2277_v24  ;;  %v2280_v40 = vpop.f32.mrb[54].mxu1 }
 0x660   : > { %v2281_v33 = vpop.f32.mrb[55].mxu1 }
 0x661   : > { %v2282_v29 = vadd.f32 %v2281_v33, %v2280_v40  ;;  %v1789_v37 = vadd.f32 %v2279_v39, %v2074_v34 }
 0x663   : > { %v1792_v10 = vadd.f32 %v2282_v29, %v2074_v34 }
 0x671   : > { %v1545_v61 = vpop.f32.mrb[64].mxu0 }
 0x672   : > { %v2470_v19 = vpop.f32.mrb[65].mxu0 }
 0x673   : > { %v1548_v30 = vpop.f32.mrb[66].mxu0 }
 0x674   : > { %v1554_v20 = vpack.c.bf16 %v1548_v30, %v1545_v61  ;;  %v2471_v5 = vpop.f32.mrb[67].mxu0 }
 0x676   : > { %2489 = vmatmul.mubr.bf16.vlgmr.msra.gmra.mrb[68].mxu0 %v1554_v20 }
 0x749   : > { %v1829_v8 = vpop.f32.mrb[68].mxu0 }
 0x74a   : > { %v1830_v41 = vadd.f32 %v1829_v8, %v1789_v37  ;;  %v2490_v42 = vpop.f32.mrb[69].mxu0 }
 0x74b   : > { %v1832_v11 = vpop.f32.mrb[70].mxu0 }
 0x74c   : > { %v1839_v27 = vsel %vm1838_vm1, %v1830_v41, -1e+30  ;;  %v1833_v16 = vadd.f32 %v1832_v11, %v1792_v10  ;;  %v2491_v17 = vpop.f32.mrb[71].mxu0 }
 0x74d   : > { %1841 = vmax.xlane.f32.xlu0 %v1839_v27 }
 0x74e   : > { %v1840_v22 = vsel %vm1838_vm1, %v1833_v16, -1e+30 }
 0x751   : > { %1843 = vmax.xlane.f32.xlu0 %v1840_v22 }
 0x7da   : > { %v1842_v23 = vpop.xlane.xlu0 %1841 }
 0x7db   : > { %v1845_v28 = vsub.f32 %v1839_v27, %v1842_v23 }
 0x7dd   : > { %v1847_v31 = vmul.f32 1.442695, %v1845_v28 }
 0x7de   : > { %v1844_v2 = vpop.xlane.xlu0 %1843 }
 0x7df   : > { %v1846_v53 = vsub.f32 %v1840_v22, %v1844_v2  ;;  %2650 = vpow2.f32 %v1847_v31 }
 0x7e1   : > { %v1849_v46 = vmul.f32 1.442695, %v1846_v53 }
 0x7e3   : > { %2652 = vpow2.f32 %v1849_v46 }
 0x7e9   : > { %v2651_v47 = vpop.eup %2650 }
 0x7ea   : > { %1851 = vadd.xlane.f32.xlu1 %v2651_v47 }
 0x7ed   : > { %v2653_v7 = vpop.eup %2652 }
 0x7ee   : > { %1853 = vadd.xlane.f32.xlu1 %v2653_v7 }
 0x877   : > { %v1852_v59 = vpop.xlane.xlu1 %1851 }
 0x878   : > { %2654 = vlog2.f32 %v1852_v59 }
 0x87b   : > { %v1854_v48 = vpop.xlane.xlu1 %1853 }
 0x87c   : > { %2656 = vlog2.f32 %v1854_v48 }
 0x882   : > { %v2655_v50 = vpop.eup %2654 }
 0x883   : > { %v1856_v51 = vmul.f32 0.6931472, %v2655_v50 }
 0x885   : > { %v1859_v52 = vsub.f32 %v1845_v28, %v1856_v51 }
 0x886   : > { %v2657_v54 = vpop.eup %2656 }
 0x887   : > { %1861 = vst [vmem:[%s402_s26] sm:$0xff] %v1859_v52  ;;  %v1858_v49 = vmul.f32 0.6931472, %v2657_v54 }
 0x889   : > { %v1860_v55 = vsub.f32 %v1846_v53, %v1858_v49 }
 0x88b   : > { %1862 = vst [vmem:[%s402_s26 + $0x8] sm:$0xff] %v1860_v55 }
 0x88c   : > { %2817 = shalt.err (!%p2814_p1)
}
 0x88d   : > { %s2818_s8 = scalar_lea.hbm %s3478_s14, 256  ;;  %s2822_s30 = scalar_lea.hbm %s3529_s7, 512 }
 0x88e   : > { %p2819_p5 = scmp.ne.s32.totalorder %s3478_s14, %s2818_s8  ;;  %p2823_p4 = scmp.lt.u32.totalorder %s3478_s14, %s3529_s7 }
 0x88f   : > { %p2824_p8 = scmp.lt.u32.totalorder %s2822_s30, %s2818_s8  ;;  %p2826_p3 = scmp.lt.u32.totalorder %s2818_s8, %s3478_s14 }
 0x890   : > { %p2820_p11 = pnand %p2819_p5, %p3579_p7 }
 0x891   : > { %p2825_p13 = por %p2824_p8, %p2823_p4 }
 0x892   : > { %p2821_p12 = pneg %p2820_p11 }
 0x893   : > { %p2827_p0 = por %p2826_p3, %p2825_p13 }
 0x895   : > { %p2828_p6 = pnand %p2827_p0, %p2821_p12 }
 0x897   : > { %2831 = shalt.err (!%p2828_p6)
}
 0x898   : > { %s2893_s29 = smov 128   ;;  %s2894_s10 = smov 8  }
 0x899   : > { %2506 = dma.vmem_to_hbm [thread:$0]  (%p3579_p7), %s3473_s19, 256, %s3478_s14, %s1864_s11, %s2893_s29, %s2893_s29, %s2894_s10  }
 0x89a PF: > { %s3580_s16 = sld [smem:[#allocation19_spill]]  ;;  %s1892_s26 = sand.u32 1, %s2866_s24  }
 0x89b   : > { %p3582_p9 = scmp.ge.s32.totalorder %s2878_s27, 2  ;;  %s1893_s20 = scalar_lea.sflag [#allocation4], %s1892_s26 }
 0x8a0   : > { %p3581_p2 = scmp.ne.s32.totalorder %s3580_s16, 0 }
 0x8a2   : > { %p2526_p10 = pnand %p3582_p9, %p3581_p2 }
 0x8a4   : > { %2861 = dma.done.wait (!%p2526_p10), %s1893_s20, 256  }
 0x8a5   : > { %2863 = vsyncadd (!%p2526_p10), %s1893_s20, 4294967040  ;;  %s3583_s27 = sld [smem:[#allocation17_spill]]  ;;  %s3584_s3 = sld [smem:[#allocation16_spill]] }
 0x8a6   : > { %s3585_s26 = sld [smem:[#allocation18_spill]]  ;;  %s3586_s24 = smov %s2870_s25 }
 0x8ab   : > { %p24_p1 = scmp.ge.s32.totalorder %s3583_s27, 4   ;;  %s3587_s25 = smov %s3584_s3 }
 0x8ad   :  { %26 = sbr.rel (!%p24_p1) target bundleno = 11 (0xb), region = 125 }
 0x8b4   :  { %1898 = vsyncpa [#allocation3], 1 }
 0x8b5   :  { %1900 = vsyncpa [#allocation3 + $0x1], 1 }
 0x8b6   :  { %1901 = vsyncpa [#allocation6], 1 }
 0x8b7   :  { %1903 = vsyncpa [#allocation6 + $0x1], 1 }
 0x8b8   :  { %1904 = vsyncpa [#allocation9], 1 }
 0x8b9   :  { %1905 = vsyncpa [#allocation4], 1 }
 0x8ba   :  { %1907 = vsyncpa [#allocation4 + $0x1], 1 }

</bundles_post_ra>
